<compile_context>
chip_gen: v7x
topology: tpu7x:2x2x1
jax: 0.10.0
libtpu: 0.0.40
codegen_flags: <defaults>
</compile_context>

<pallas_src>
import functools

import jax
import jax.numpy as jnp
from jax import lax
from jax.experimental import pallas as pl
from jax.experimental.pallas import tpu as pltpu


EXPANSION = 4


# ----------------------------------------------------------------------------
# Fused Bottleneck kernel (one grid step == one image)
# ----------------------------------------------------------------------------
def _bottleneck_kernel(*refs, H, W, Hp, Wp, Ho, Wo, stride, projection):
    if projection:
        (x_ref, w1_ref, s1_ref, b1_ref, w2_ref, s2_ref, b2_ref,
         w3_ref, s3_ref, b3_ref, ws_ref, ss_ref, bs_ref,
         o_ref, h1_scr) = refs
    else:
        (x_ref, w1_ref, s1_ref, b1_ref, w2_ref, s2_ref, b2_ref,
         w3_ref, s3_ref, b3_ref, o_ref, h1_scr) = refs

    Cin = x_ref.shape[-1]
    planes = w1_ref.shape[-1]
    Cout = w3_ref.shape[-1]

    # Zero the whole bf16 scratch every step (the halo ring must be zero; the
    # interior is overwritten right below).  Re-zeroing every iteration keeps
    # the kernel correct even if the grid is sharded across TensorCores.
    h1_scr[...] = jnp.zeros_like(h1_scr)

    x3 = x_ref[0]                                   # (H, W, Cin) fp32
    xflat = x3.reshape(H * W, Cin)

    # ---- conv1 (1x1) + bn1 + relu over the *interior* only ----
    h1 = jnp.dot(xflat.astype(jnp.bfloat16), w1_ref[...],
                 preferred_element_type=jnp.float32)          # (H*W, planes)
    h1 = jnp.maximum(h1 * s1_ref[...] + b1_ref[...], 0.0)
    h1_scr[pl.ds(1, H), pl.ds(1, W), :] = (
        h1.astype(jnp.bfloat16).reshape(H, W, planes))

    # ---- conv2 (3x3, stride, pad=1) + bn2 + relu, K-fused over kw taps ----
    h1p = h1_scr[...]                               # (Hp, Wp, planes) bf16
    span_h = (Ho - 1) * stride + 1
    span_w = (Wo - 1) * stride + 1
    shifts = [
        lax.slice(h1p, (0, kw, 0), (Hp, kw + span_w, planes), (1, stride, 1))
        for kw in range(3)
    ]                                               # 3 x (Hp, Wo, planes)
    h1cat = jnp.concatenate(shifts, axis=-1)        # (Hp, Wo, 3*planes)

    acc = jnp.zeros((Ho * Wo, planes), jnp.float32)
    for kh in range(3):
        patch = lax.slice(h1cat, (kh, 0, 0),
                          (kh + span_h, Wo, 3 * planes), (stride, 1, 1))
        acc += jnp.dot(patch.reshape(Ho * Wo, 3 * planes), w2_ref[kh],
                       preferred_element_type=jnp.float32)
    h2 = jnp.maximum(acc * s2_ref[...] + b2_ref[...], 0.0)    # (Ho*Wo, planes)

    # ---- conv3 (1x1) + bn3 ----
    main = jnp.dot(h2.astype(jnp.bfloat16), w3_ref[...],
                   preferred_element_type=jnp.float32)        # (Ho*Wo, Cout)
    main = main * s3_ref[...] + b3_ref[...]

    # ---- shortcut (fp32 residual, read from the unpadded input block) ----
    if projection:
        xs = lax.slice(x3, (0, 0, 0), (span_h, span_w, Cin),
                       (stride, stride, 1)).reshape(Ho * Wo, Cin)
        sc = jnp.dot(xs.astype(jnp.bfloat16), ws_ref[...],
                     preferred_element_type=jnp.float32)
        sc = sc * ss_ref[...] + bs_ref[...]
    else:
        sc = xflat          # identity shortcut (stride == 1, Cin == Cout), fp32

    # Flat, lane-dense output slab (N, Ho*Wo, Cout); reshape happens outside.
    o_ref[0] = jnp.maximum(main + sc, 0.0).astype(o_ref.dtype)


# ----------------------------------------------------------------------------
# Wrapper
# ----------------------------------------------------------------------------
def _round_up(x, m):
    return (x + m - 1) // m * m


def _full_spec(a):
    return pl.BlockSpec(a.shape, lambda n, nd=a.ndim: (0,) * nd)


def bottleneck_forward(p, x_nchw, stride):
    # NCHW -> NHWC at the module boundary (channels map to TPU lanes).
    x = jnp.transpose(x_nchw, (0, 2, 3, 1))
    N, H, W, Cin = x.shape
    planes = p['w1'].shape[1]
    Cout = p['w3'].shape[1]
    projection = 'ws' in p

    Ho = (H - 1) // stride + 1
    Wo = (W - 1) // stride + 1
    Hp = H + 2
    Wp = _round_up(W + 2, 16)   # bf16 sublane-tile-aligned scratch width

    bf16 = jnp.bfloat16
    # w2: HWIO (3,3,planes,planes) -> (kh, kw*planes + cin, cout) for K-fusion.
    w2 = p['w2'].reshape(3, 3 * planes, planes).astype(bf16)

    args = [x,
            p['w1'].astype(bf16), p['s1'], p['b1'],
            w2, p['s2'], p['b2'],
            p['w3'].astype(bf16), p['s3'], p['b3']]
    if projection:
        args += [p['ws'].astype(bf16), p['ss'], p['bs']]

    in_specs = ([pl.BlockSpec((1, H, W, Cin), lambda n: (n, 0, 0, 0))]
                + [_full_spec(a) for a in args[1:]])

    kernel = functools.partial(_bottleneck_kernel, H=H, W=W, Hp=Hp, Wp=Wp,
                               Ho=Ho, Wo=Wo, stride=stride,
                               projection=projection)

    out_flat = pl.pallas_call(
        kernel,
        out_shape=jax.ShapeDtypeStruct((N, Ho * Wo, Cout), jnp.float32),
        grid=(N,),
        in_specs=in_specs,
        out_specs=pl.BlockSpec((1, Ho * Wo, Cout), lambda n: (n, 0, 0)),
        scratch_shapes=[pltpu.VMEM((Hp, Wp, planes), jnp.bfloat16)],
        compiler_params=pltpu.CompilerParams(
            dimension_semantics=("parallel",),
            vmem_limit_bytes=32 * 1024 * 1024),
    )(*args)

    out = out_flat.reshape(N, Ho, Wo, Cout)
    return jnp.transpose(out, (0, 3, 1, 2))           # NHWC -> NCHW


# ----------------------------------------------------------------------------
# Parameter init (BN folded into scale/bias, inference form)
# ----------------------------------------------------------------------------
def init_params(key, in_planes, planes, stride):
    out_planes = EXPANSION * planes
    keys = jax.random.split(key, 8)

    def bn_fold(k, c):
        k1, k2, k3, k4 = jax.random.split(k, 4)
        gamma = jax.random.uniform(k1, (c,), jnp.float32, 0.5, 1.5)
        beta = 0.1 * jax.random.normal(k2, (c,), jnp.float32)
        mean = 0.1 * jax.random.normal(k3, (c,), jnp.float32)
        var = jax.random.uniform(k4, (c,), jnp.float32, 0.5, 1.5)
        eps = 1e-5
        s = gamma / jnp.sqrt(var + eps)
        b = beta - mean * s
        return s.reshape(1, c), b.reshape(1, c)

    p = {}
    p['w1'] = 0.1 * jax.random.normal(keys[0], (in_planes, planes), jnp.float32)
    p['s1'], p['b1'] = bn_fold(keys[1], planes)
    p['w2'] = 0.1 * jax.random.normal(keys[2], (3, 3, planes, planes), jnp.float32)  # HWIO
    p['s2'], p['b2'] = bn_fold(keys[3], planes)
    p['w3'] = 0.1 * jax.random.normal(keys[4], (planes, out_planes), jnp.float32)
    p['s3'], p['b3'] = bn_fold(keys[5], out_planes)
    if stride != 1 or in_planes != out_planes:
        p['ws'] = 0.1 * jax.random.normal(keys[6], (in_planes, out_planes), jnp.float32)
        p['ss'], p['bs'] = bn_fold(keys[7], out_planes)
    return p


# ----------------------------------------------------------------------------
# Pure-JAX reference (fp32) for correctness check
# ----------------------------------------------------------------------------
def reference_forward(p, x_nchw, stride):
    x = jnp.transpose(x_nchw, (0, 2, 3, 1))

    def conv1x1(z, w):
        return jnp.einsum('nhwc,cd->nhwd', z, w)

    def bn(z, s, b):
        return z * s.reshape(1, 1, 1, -1) + b.reshape(1, 1, 1, -1)

    h = jax.nn.relu(bn(conv1x1(x, p['w1']), p['s1'][0], p['b1'][0]))
    h = lax.conv_general_dilated(h, p['w2'], (stride, stride), ((1, 1), (1, 1)),
                                 dimension_numbers=('NHWC', 'HWIO', 'NHWC'))
    h = jax.nn.relu(bn(h, p['s2'][0], p['b2'][0]))
    main = bn(conv1x1(h, p['w3']), p['s3'][0], p['b3'][0])
    xs = x[:, ::stride, ::stride, :]
    if 'ws' in p:
        sc = bn(conv1x1(xs, p['ws']), p['ss'][0], p['bs'][0])
    else:
        sc = xs
    out = jax.nn.relu(main + sc)
    return jnp.transpose(out, (0, 3, 1, 2))


# ----------------------------------------------------------------------------
if __name__ == "__main__":
    key = jax.random.PRNGKey(0)

    configs = [
        (4, 4, 1),    # projection shortcut (4 != 16)
        (16, 4, 1),   # identity shortcut
        (4, 4, 2),    # strided projection shortcut
    ]
    for idx, (in_planes, planes, stride) in enumerate(configs):
        kx, kp = jax.random.split(jax.random.fold_in(key, idx))
        x = jax.random.normal(kx, (2, in_planes, 16, 16), jnp.float32)
        params = init_params(kp, in_planes, planes, stride)

        out = jax.block_until_ready(bottleneck_forward(params, x, stride))
        ref = reference_forward(params, x, stride)

        Ho = (16 - 1) // stride + 1
        assert out.shape == ref.shape == (2, EXPANSION * planes, Ho, Ho)
        max_err = float(jnp.max(jnp.abs(out - ref)))
        # bf16 MXU operands (fp32 accumulation, fp32 residual) -> loose-ish tol.
        if not jnp.allclose(out, ref, atol=5e-2, rtol=5e-2):
            raise RuntimeError(
                f"config {idx} {(in_planes, planes, stride)}: mismatch vs "
                f"reference, max abs err = {max_err:e}")

    print("KERNEL_OK")
</pallas_src>

<mosaic_0001>
module attributes {stable_mosaic.version = 11 : i64} {
  func.func @_bottleneck_kernel(%arg0: i32, %arg1: memref<1x16x16x4xf32, #tpu.memory_space<vmem>>, %arg2: memref<4x4xbf16, #tpu.memory_space<vmem>>, %arg3: memref<1x4xf32, #tpu.memory_space<vmem>>, %arg4: memref<1x4xf32, #tpu.memory_space<vmem>>, %arg5: memref<3x12x4xbf16, #tpu.memory_space<vmem>>, %arg6: memref<1x4xf32, #tpu.memory_space<vmem>>, %arg7: memref<1x4xf32, #tpu.memory_space<vmem>>, %arg8: memref<4x16xbf16, #tpu.memory_space<vmem>>, %arg9: memref<1x16xf32, #tpu.memory_space<vmem>>, %arg10: memref<1x16xf32, #tpu.memory_space<vmem>>, %arg11: memref<4x16xbf16, #tpu.memory_space<vmem>>, %arg12: memref<1x16xf32, #tpu.memory_space<vmem>>, %arg13: memref<1x16xf32, #tpu.memory_space<vmem>>, %arg14: memref<1x256x16xf32, #tpu.memory_space<vmem>>, %arg15: memref<18x32x4xbf16, #tpu.memory_space<vmem>>) attributes {dimension_semantics = [#tpu.dimension_semantics<parallel>], iteration_bounds = array<i64: 2>, scalar_prefetch = 0 : i64, scratch_operands = 1 : i64, tpu.core_type = #tpu.core_type<tc>, window_params = [{transform_indices = @transform_0, window_bounds = array<i64: 1, 16, 16, 4>}, {pipeline_mode = #tpu.pipeline_mode<synchronous>, transform_indices = @transform_1, window_bounds = array<i64: 4, 4>}, {pipeline_mode = #tpu.pipeline_mode<synchronous>, transform_indices = @transform_2, window_bounds = array<i64: 1, 4>}, {pipeline_mode = #tpu.pipeline_mode<synchronous>, transform_indices = @transform_3, window_bounds = array<i64: 1, 4>}, {pipeline_mode = #tpu.pipeline_mode<synchronous>, transform_indices = @transform_4, window_bounds = array<i64: 3, 12, 4>}, {pipeline_mode = #tpu.pipeline_mode<synchronous>, transform_indices = @transform_5, window_bounds = array<i64: 1, 4>}, {pipeline_mode = #tpu.pipeline_mode<synchronous>, transform_indices = @transform_6, window_bounds = array<i64: 1, 4>}, {pipeline_mode = #tpu.pipeline_mode<synchronous>, transform_indices = @transform_7, window_bounds = array<i64: 4, 16>}, {pipeline_mode = #tpu.pipeline_mode<synchronous>, transform_indices = @transform_8, window_bounds = array<i64: 1, 16>}, {pipeline_mode = #tpu.pipeline_mode<synchronous>, transform_indices = @transform_9, window_bounds = array<i64: 1, 16>}, {pipeline_mode = #tpu.pipeline_mode<synchronous>, transform_indices = @transform_10, window_bounds = array<i64: 4, 16>}, {pipeline_mode = #tpu.pipeline_mode<synchronous>, transform_indices = @transform_11, window_bounds = array<i64: 1, 16>}, {pipeline_mode = #tpu.pipeline_mode<synchronous>, transform_indices = @transform_12, window_bounds = array<i64: 1, 16>}, {transform_indices = @transform_13, window_bounds = array<i64: 1, 256, 16>}]} {
    %cst = arith.constant 0.000000e+00 : bf16
    %0 = vector.broadcast %cst : bf16 to vector<18x32x4xbf16>
    %c0 = arith.constant 0 : index
    %c0_0 = arith.constant 0 : index
    %c0_1 = arith.constant 0 : index
    %1 = vector.load %arg15[%c0, %c0_0, %c0_1] : memref<18x32x4xbf16, #tpu.memory_space<vmem>>, vector<18x32x4xbf16>
    tpu.vector_store %arg15[%c0, %c0_0, %c0_1], %0 {strides = array<i32>} : memref<18x32x4xbf16, #tpu.memory_space<vmem>>, vector<18x32x4xbf16>,
    %c0_2 = arith.constant 0 : index
    %c0_3 = arith.constant 0 : index
    %c0_4 = arith.constant 0 : index
    %c0_5 = arith.constant 0 : index
    %2 = vector.load %arg1[%c0_2, %c0_3, %c0_4, %c0_5] : memref<1x16x16x4xf32, #tpu.memory_space<vmem>>, vector<1x16x16x4xf32>
    %3 = vector.shape_cast %2 : vector<1x16x16x4xf32> to vector<16x16x4xf32>
    %4 = vector.shape_cast %3 : vector<16x16x4xf32> to vector<256x4xf32>
    %5 = arith.truncf %4 : vector<256x4xf32> to vector<256x4xbf16>
    %c0_6 = arith.constant 0 : index
    %c0_7 = arith.constant 0 : index
    %6 = vector.load %arg2[%c0_6, %c0_7] : memref<4x4xbf16, #tpu.memory_space<vmem>>, vector<4x4xbf16>
    %cst_8 = arith.constant dense<0.000000e+00> : vector<256x4xf32>
    %7 = tpu.matmul %5, %6, %cst_8 {dimension_numbers = #tpu.dot_dimension_numbers<[1], [0], [0], [1], [0, 0, 1, 1], [], []>} : vector<256x4xbf16>, vector<4x4xbf16>, vector<256x4xf32> -> vector<256x4xf32>
    %c0_9 = arith.constant 0 : index
    %c0_10 = arith.constant 0 : index
    %8 = vector.load %arg3[%c0_9, %c0_10] : memref<1x4xf32, #tpu.memory_space<vmem>>, vector<1x4xf32>
    %9 = vector.broadcast %8 : vector<1x4xf32> to vector<256x4xf32>
    %10 = arith.mulf %7, %9 : vector<256x4xf32>
    %c0_11 = arith.constant 0 : index
    %c0_12 = arith.constant 0 : index
    %11 = vector.load %arg4[%c0_11, %c0_12] : memref<1x4xf32, #tpu.memory_space<vmem>>, vector<1x4xf32>
    %12 = vector.broadcast %11 : vector<1x4xf32> to vector<256x4xf32>
    %13 = arith.addf %10, %12 : vector<256x4xf32>
    %cst_13 = arith.constant 0.000000e+00 : f32
    %14 = vector.broadcast %cst_13 : f32 to vector<256x4xf32>
    %15 = arith.maximumf %13, %14 : vector<256x4xf32>
    %16 = arith.truncf %15 : vector<256x4xf32> to vector<256x4xbf16>
    %17 = vector.shape_cast %16 : vector<256x4xbf16> to vector<16x16x4xbf16>
    %c1 = arith.constant 1 : index
    %c1_14 = arith.constant 1 : index
    %c0_15 = arith.constant 0 : index
    %18 = vector.load %arg15[%c1, %c1_14, %c0_15] : memref<18x32x4xbf16, #tpu.memory_space<vmem>>, vector<16x16x4xbf16>
    tpu.vector_store %arg15[%c1, %c1_14, %c0_15], %17 {strides = array<i32>} : memref<18x32x4xbf16, #tpu.memory_space<vmem>>, vector<16x16x4xbf16>,
    %c0_16 = arith.constant 0 : index
    %c0_17 = arith.constant 0 : index
    %c0_18 = arith.constant 0 : index
    %19 = vector.load %arg15[%c0_16, %c0_17, %c0_18] : memref<18x32x4xbf16, #tpu.memory_space<vmem>>, vector<18x32x4xbf16>
    %20 = vector.extract_strided_slice %19 {offsets = [0, 0, 0], sizes = [18, 16, 4], strides = [1, 1, 1]} : vector<18x32x4xbf16> to vector<18x16x4xbf16>
    %21 = vector.extract_strided_slice %19 {offsets = [0, 1, 0], sizes = [18, 16, 4], strides = [1, 1, 1]} : vector<18x32x4xbf16> to vector<18x16x4xbf16>
    %22 = vector.extract_strided_slice %19 {offsets = [0, 2, 0], sizes = [18, 16, 4], strides = [1, 1, 1]} : vector<18x32x4xbf16> to vector<18x16x4xbf16>
    %23 = tpu.concatenate %20, %21, %22 in 2 : vector<18x16x4xbf16>, vector<18x16x4xbf16>, vector<18x16x4xbf16> -> vector<18x16x12xbf16>
    %cst_19 = arith.constant 0.000000e+00 : f32
    %24 = vector.broadcast %cst_19 : f32 to vector<256x4xf32>
    %25 = vector.extract_strided_slice %23 {offsets = [0, 0, 0], sizes = [16, 16, 12], strides = [1, 1, 1]} : vector<18x16x12xbf16> to vector<16x16x12xbf16>
    %26 = vector.shape_cast %25 : vector<16x16x12xbf16> to vector<256x12xbf16>
    %c0_20 = arith.constant 0 : index
    %c0_21 = arith.constant 0 : index
    %c0_22 = arith.constant 0 : index
    %27 = vector.load %arg5[%c0_20, %c0_21, %c0_22] : memref<3x12x4xbf16, #tpu.memory_space<vmem>>, vector<1x12x4xbf16>
    %28 = vector.shape_cast %27 : vector<1x12x4xbf16> to vector<12x4xbf16>
    %cst_23 = arith.constant dense<0.000000e+00> : vector<256x4xf32>
    %29 = tpu.matmul %26, %28, %cst_23 {dimension_numbers = #tpu.dot_dimension_numbers<[1], [0], [0], [1], [0, 0, 1, 1], [], []>} : vector<256x12xbf16>, vector<12x4xbf16>, vector<256x4xf32> -> vector<256x4xf32>
    %30 = arith.addf %24, %29 : vector<256x4xf32>
    %31 = vector.extract_strided_slice %23 {offsets = [1, 0, 0], sizes = [16, 16, 12], strides = [1, 1, 1]} : vector<18x16x12xbf16> to vector<16x16x12xbf16>
    %32 = vector.shape_cast %31 : vector<16x16x12xbf16> to vector<256x12xbf16>
    %c1_24 = arith.constant 1 : index
    %c0_25 = arith.constant 0 : index
    %c0_26 = arith.constant 0 : index
    %33 = vector.load %arg5[%c1_24, %c0_25, %c0_26] : memref<3x12x4xbf16, #tpu.memory_space<vmem>>, vector<1x12x4xbf16>
    %34 = vector.shape_cast %33 : vector<1x12x4xbf16> to vector<12x4xbf16>
    %cst_27 = arith.constant dense<0.000000e+00> : vector<256x4xf32>
    %35 = tpu.matmul %32, %34, %cst_27 {dimension_numbers = #tpu.dot_dimension_numbers<[1], [0], [0], [1], [0, 0, 1, 1], [], []>} : vector<256x12xbf16>, vector<12x4xbf16>, vector<256x4xf32> -> vector<256x4xf32>
    %36 = arith.addf %30, %35 : vector<256x4xf32>
    %37 = vector.extract_strided_slice %23 {offsets = [2, 0, 0], sizes = [16, 16, 12], strides = [1, 1, 1]} : vector<18x16x12xbf16> to vector<16x16x12xbf16>
    %38 = vector.shape_cast %37 : vector<16x16x12xbf16> to vector<256x12xbf16>
    %c2 = arith.constant 2 : index
    %c0_28 = arith.constant 0 : index
    %c0_29 = arith.constant 0 : index
    %39 = vector.load %arg5[%c2, %c0_28, %c0_29] : memref<3x12x4xbf16, #tpu.memory_space<vmem>>, vector<1x12x4xbf16>
    %40 = vector.shape_cast %39 : vector<1x12x4xbf16> to vector<12x4xbf16>
    %cst_30 = arith.constant dense<0.000000e+00> : vector<256x4xf32>
    %41 = tpu.matmul %38, %40, %cst_30 {dimension_numbers = #tpu.dot_dimension_numbers<[1], [0], [0], [1], [0, 0, 1, 1], [], []>} : vector<256x12xbf16>, vector<12x4xbf16>, vector<256x4xf32> -> vector<256x4xf32>
    %42 = arith.addf %36, %41 : vector<256x4xf32>
    %c0_31 = arith.constant 0 : index
    %c0_32 = arith.constant 0 : index
    %43 = vector.load %arg6[%c0_31, %c0_32] : memref<1x4xf32, #tpu.memory_space<vmem>>, vector<1x4xf32>
    %44 = vector.broadcast %43 : vector<1x4xf32> to vector<256x4xf32>
    %45 = arith.mulf %42, %44 : vector<256x4xf32>
    %c0_33 = arith.constant 0 : index
    %c0_34 = arith.constant 0 : index
    %46 = vector.load %arg7[%c0_33, %c0_34] : memref<1x4xf32, #tpu.memory_space<vmem>>, vector<1x4xf32>
    %47 = vector.broadcast %46 : vector<1x4xf32> to vector<256x4xf32>
    %48 = arith.addf %45, %47 : vector<256x4xf32>
    %cst_35 = arith.constant 0.000000e+00 : f32
    %49 = vector.broadcast %cst_35 : f32 to vector<256x4xf32>
    %50 = arith.maximumf %48, %49 : vector<256x4xf32>
    %51 = arith.truncf %50 : vector<256x4xf32> to vector<256x4xbf16>
    %c0_36 = arith.constant 0 : index
    %c0_37 = arith.constant 0 : index
    %52 = vector.load %arg8[%c0_36, %c0_37] : memref<4x16xbf16, #tpu.memory_space<vmem>>, vector<4x16xbf16>
    %cst_38 = arith.constant dense<0.000000e+00> : vector<256x16xf32>
    %53 = tpu.matmul %51, %52, %cst_38 {dimension_numbers = #tpu.dot_dimension_numbers<[1], [0], [0], [1], [0, 0, 1, 1], [], []>} : vector<256x4xbf16>, vector<4x16xbf16>, vector<256x16xf32> -> vector<256x16xf32>
    %c0_39 = arith.constant 0 : index
    %c0_40 = arith.constant 0 : index
    %54 = vector.load %arg9[%c0_39, %c0_40] : memref<1x16xf32, #tpu.memory_space<vmem>>, vector<1x16xf32>
    %55 = vector.broadcast %54 : vector<1x16xf32> to vector<256x16xf32>
    %56 = arith.mulf %53, %55 : vector<256x16xf32>
    %c0_41 = arith.constant 0 : index
    %c0_42 = arith.constant 0 : index
    %57 = vector.load %arg10[%c0_41, %c0_42] : memref<1x16xf32, #tpu.memory_space<vmem>>, vector<1x16xf32>
    %58 = vector.broadcast %57 : vector<1x16xf32> to vector<256x16xf32>
    %59 = arith.addf %56, %58 : vector<256x16xf32>
    %60 = vector.extract_strided_slice %3 {offsets = [0, 0, 0], sizes = [16, 16, 4], strides = [1, 1, 1]} : vector<16x16x4xf32> to vector<16x16x4xf32>
    %61 = vector.shape_cast %60 : vector<16x16x4xf32> to vector<256x4xf32>
    %62 = arith.truncf %61 : vector<256x4xf32> to vector<256x4xbf16>
    %c0_43 = arith.constant 0 : index
    %c0_44 = arith.constant 0 : index
    %63 = vector.load %arg11[%c0_43, %c0_44] : memref<4x16xbf16, #tpu.memory_space<vmem>>, vector<4x16xbf16>
    %cst_45 = arith.constant dense<0.000000e+00> : vector<256x16xf32>
    %64 = tpu.matmul %62, %63, %cst_45 {dimension_numbers = #tpu.dot_dimension_numbers<[1], [0], [0], [1], [0, 0, 1, 1], [], []>} : vector<256x4xbf16>, vector<4x16xbf16>, vector<256x16xf32> -> vector<256x16xf32>
    %c0_46 = arith.constant 0 : index
    %c0_47 = arith.constant 0 : index
    %65 = vector.load %arg12[%c0_46, %c0_47] : memref<1x16xf32, #tpu.memory_space<vmem>>, vector<1x16xf32>
    %66 = vector.broadcast %65 : vector<1x16xf32> to vector<256x16xf32>
    %67 = arith.mulf %64, %66 : vector<256x16xf32>
    %c0_48 = arith.constant 0 : index
    %c0_49 = arith.constant 0 : index
    %68 = vector.load %arg13[%c0_48, %c0_49] : memref<1x16xf32, #tpu.memory_space<vmem>>, vector<1x16xf32>
    %69 = vector.broadcast %68 : vector<1x16xf32> to vector<256x16xf32>
    %70 = arith.addf %67, %69 : vector<256x16xf32>
    %71 = arith.addf %59, %70 : vector<256x16xf32>
    %cst_50 = arith.constant 0.000000e+00 : f32
    %72 = vector.broadcast %cst_50 : f32 to vector<256x16xf32>
    %73 = arith.maximumf %71, %72 : vector<256x16xf32>
    %c0_51 = arith.constant 0 : index
    %c0_52 = arith.constant 0 : index
    %c0_53 = arith.constant 0 : index
    %74 = vector.load %arg14[%c0_51, %c0_52, %c0_53] : memref<1x256x16xf32, #tpu.memory_space<vmem>>, vector<1x256x16xf32>
    %75 = vector.shape_cast %74 : vector<1x256x16xf32> to vector<256x16xf32>
    %76 = vector.shape_cast %73 : vector<256x16xf32> to vector<1x256x16xf32>
    tpu.vector_store %arg14[%c0_51, %c0_52, %c0_53], %76 {strides = array<i32>} : memref<1x256x16xf32, #tpu.memory_space<vmem>>, vector<1x256x16xf32>,
    return
  }
  func.func @transform_0(%arg0: i32) -> (i32, i32, i32, i32) {
    %c0_i32 = arith.constant 0 : i32
    %c0_i32_0 = arith.constant 0 : i32
    %c0_i32_1 = arith.constant 0 : i32
    %c0_i32_2 = arith.constant 0 : i32
    return %arg0, %c0_i32, %c0_i32_0, %c0_i32_1 : i32, i32, i32, i32
  }
  func.func @transform_1(%arg0: i32) -> (i32, i32) {
    %c0_i32 = arith.constant 0 : i32
    %c0_i32_0 = arith.constant 0 : i32
    %c0_i32_1 = arith.constant 0 : i32
    return %c0_i32, %c0_i32_0 : i32, i32
  }
  func.func @transform_2(%arg0: i32) -> (i32, i32) {
    %c0_i32 = arith.constant 0 : i32
    %c0_i32_0 = arith.constant 0 : i32
    %c0_i32_1 = arith.constant 0 : i32
    return %c0_i32, %c0_i32_0 : i32, i32
  }
  func.func @transform_3(%arg0: i32) -> (i32, i32) {
    %c0_i32 = arith.constant 0 : i32
    %c0_i32_0 = arith.constant 0 : i32
    %c0_i32_1 = arith.constant 0 : i32
    return %c0_i32, %c0_i32_0 : i32, i32
  }
  func.func @transform_4(%arg0: i32) -> (i32, i32, i32) {
    %c0_i32 = arith.constant 0 : i32
    %c0_i32_0 = arith.constant 0 : i32
    %c0_i32_1 = arith.constant 0 : i32
    %c0_i32_2 = arith.constant 0 : i32
    return %c0_i32, %c0_i32_0, %c0_i32_1 : i32, i32, i32
  }
  func.func @transform_5(%arg0: i32) -> (i32, i32) {
    %c0_i32 = arith.constant 0 : i32
    %c0_i32_0 = arith.constant 0 : i32
    %c0_i32_1 = arith.constant 0 : i32
    return %c0_i32, %c0_i32_0 : i32, i32
  }
  func.func @transform_6(%arg0: i32) -> (i32, i32) {
    %c0_i32 = arith.constant 0 : i32
    %c0_i32_0 = arith.constant 0 : i32
    %c0_i32_1 = arith.constant 0 : i32
    return %c0_i32, %c0_i32_0 : i32, i32
  }
  func.func @transform_7(%arg0: i32) -> (i32, i32) {
    %c0_i32 = arith.constant 0 : i32
    %c0_i32_0 = arith.constant 0 : i32
    %c0_i32_1 = arith.constant 0 : i32
    return %c0_i32, %c0_i32_0 : i32, i32
  }
  func.func @transform_8(%arg0: i32) -> (i32, i32) {
    %c0_i32 = arith.constant 0 : i32
    %c0_i32_0 = arith.constant 0 : i32
    %c0_i32_1 = arith.constant 0 : i32
    return %c0_i32, %c0_i32_0 : i32, i32
  }
  func.func @transform_9(%arg0: i32) -> (i32, i32) {
    %c0_i32 = arith.constant 0 : i32
    %c0_i32_0 = arith.constant 0 : i32
    %c0_i32_1 = arith.constant 0 : i32
    return %c0_i32, %c0_i32_0 : i32, i32
  }
  func.func @transform_10(%arg0: i32) -> (i32, i32) {
    %c0_i32 = arith.constant 0 : i32
    %c0_i32_0 = arith.constant 0 : i32
    %c0_i32_1 = arith.constant 0 : i32
    return %c0_i32, %c0_i32_0 : i32, i32
  }
  func.func @transform_11(%arg0: i32) -> (i32, i32) {
    %c0_i32 = arith.constant 0 : i32
    %c0_i32_0 = arith.constant 0 : i32
    %c0_i32_1 = arith.constant 0 : i32
    return %c0_i32, %c0_i32_0 : i32, i32
  }
  func.func @transform_12(%arg0: i32) -> (i32, i32) {
    %c0_i32 = arith.constant 0 : i32
    %c0_i32_0 = arith.constant 0 : i32
    %c0_i32_1 = arith.constant 0 : i32
    return %c0_i32, %c0_i32_0 : i32, i32
  }
  func.func @transform_13(%arg0: i32) -> (i32, i32, i32) {
    %c0_i32 = arith.constant 0 : i32
    %c0_i32_0 = arith.constant 0 : i32
    %c0_i32_1 = arith.constant 0 : i32
    return %arg0, %c0_i32, %c0_i32_0 : i32, i32, i32
  }
}

</mosaic_0001>

<bundles_post_ra>
// kernel: tpu_custom_call.1
= control target key start
LH: loop header
LB: loop body
LE: loop exit
PB: predicated region body
PF: predicated region fallthrough
CT: control target
= control target key end

     0   :  { %s3595_s25 = smov 0   ;;  %s4715_s0 = inlined_call_operand.vmem [shape: f32[2,16,16,4], index: 0, kind: input, shape index: {}]   ;;  %s4716_s1 = inlined_call_operand.vmem [shape: bf16[4,4], index: 1, kind: input, shape index: {}]   ;;  %s4717_s2 = inlined_call_operand.vmem [shape: f32[1,4], index: 2, kind: input, shape index: {}]   ;;  %s4718_s3 = inlined_call_operand.vmem [shape: f32[1,4], index: 3, kind: input, shape index: {}]   ;;  %s4719_s4 = inlined_call_operand.vmem [shape: bf16[3,12,4], index: 4, kind: input, shape index: {}]   ;;  %s4720_s5 = inlined_call_operand.vmem [shape: f32[1,4], index: 5, kind: input, shape index: {}]   ;;  %s4721_s6 = inlined_call_operand.vmem [shape: f32[1,4], index: 6, kind: input, shape index: {}]   ;;  %s4722_s7 = inlined_call_operand.vmem [shape: bf16[4,16], index: 7, kind: input, shape index: {}]   ;;  %s4723_s8 = inlined_call_operand.vmem [shape: f32[1,16], index: 8, kind: input, shape index: {}]   ;;  %s4724_s9 = inlined_call_operand.vmem [shape: f32[1,16], index: 9, kind: input, shape index: {}]   ;;  %s4725_s10 = inlined_call_operand.vmem [shape: bf16[4,16], index: 10, kind: input, shape index: {}]   ;;  %s4726_s11 = inlined_call_operand.vmem [shape: f32[1,16], index: 11, kind: input, shape index: {}]   ;;  %s4727_s12 = inlined_call_operand.vmem [shape: f32[1,16], index: 12, kind: input, shape index: {}]   ;;  %s4728_s13 = inlined_call_operand.vmem [shape: f32[2,256,16], index: 13, kind: output, shape index: {}]  }
   0x1 LB: > { %s3000_s26 = sadd.s32 4294967295, %s3520_s25   ;;  %p3004_p0 = scmp.ge.s32.totalorder %s3520_s25, 1  ;;  %s3520_s25 = sphi %s3595_s25, %s23_s25  }
   0x2   : > { %p387_p1 = scmp.lt.s32.totalorder %s3520_s25, 3 }
   0x4   : > { %p388_p2 = pnand %p3004_p0, %p387_p1 }
   0x5   : > { %v527_v0 = vld [vmem:[%s4716_s1] sm:$0x3] (!%p388_p2)  ;;  %vm576_vm0 = vcmask (!%p388_p2), 1041408   ;;  %p431_p3 = scmp.lt.s32.totalorder (!%p388_p2), %s3000_s26, 1  ;;  %vm442_vm1 = vcmask (!%p388_p2), 31744   ;;  %v3522_v50 = vmov (!%p388_p2), 0  }
   0x6   : > { %391 = sbr.rel (%p388_p2) target bundleno = 1101 (0x44d), region = 72  ;;  %3494 = vmatprep.subr.msk.bf16.mxu0 (!%p388_p2), %vm576_vm0, %v527_v0  ;;  %v578_v1 = vsel (!%p388_p2), %vm576_vm0, %v527_v0, 0  ;;  %447 = vst.msk [vmem:[#allocation2 + $0x20] sm:$0xff] (!%p388_p2), %vm442_vm1, %v3522_v50  ;;  %448 = vst.msk [vmem:[#allocation2 + $0x28] sm:$0xff] (!%p388_p2), %vm442_vm1, %v3522_v50  ;;  %v3753_v51 = vld [vmem:[%s4717_s2] ss:$0 sm:$0xff] (!%p388_p2) }
   0x7   : > { %3227 = vmatpush3.bf16.msra.mxu0 (!%p388_p2), %v578_v1  ;;  %443 = vst.msk [vmem:[#allocation2] sm:$0xff] (!%p388_p2), %vm442_vm1, %v3522_v50  ;;  %444 = vst.msk [vmem:[#allocation2 + $0x8] sm:$0xff] (!%p388_p2), %vm442_vm1, %v3522_v50  ;;  %v3758_v53 = vld [vmem:[%s4718_s3] ss:$0 sm:$0xff] (!%p388_p2)  ;;  %vm1018_vm2 = vcmask (!%p388_p2), 24576   ;;  %vm1439_vm7 = vcmask (!%p388_p2), 1046528  }
   0x8   : > { %445 = vst.msk [vmem:[#allocation2 + $0x10] sm:$0xff] (!%p388_p2), %vm442_vm1, %v3522_v50  ;;  %446 = vst.msk [vmem:[#allocation2 + $0x18] sm:$0xff] (!%p388_p2), %vm442_vm1, %v3522_v50  ;;  %vm1019_vm3 = vsmask.f32 (!%p388_p2), 256  ;;  %vm1013_vm4 = vsmask.f32 (!%p388_p2), 7938 }
   0x9   : > { %449 = vst.msk [vmem:[#allocation2 + $0x30] sm:$0xff] (!%p388_p2), %vm442_vm1, %v3522_v50  ;;  %450 = vst.msk [vmem:[#allocation2 + $0x38] sm:$0xff] (!%p388_p2), %vm442_vm1, %v3522_v50  ;;  %vm1150_vm8 = vsmask.f32 (!%p388_p2), 7424  ;;  %s3523_s20 = smov (!%p388_p2), 8   ;;  %s3524_s21 = smov (!%p388_p2), 4  }
   0xa   : > { %451 = vst.msk [vmem:[#allocation2 + $0x40] sm:$0xff] (!%p388_p2), %vm442_vm1, %v3522_v50  ;;  %452 = vst.msk [vmem:[#allocation2 + $0x48] sm:$0xff] (!%p388_p2), %vm442_vm1, %v3522_v50  ;;  %vm1646_vm9 = vcmask (!%p388_p2), 1045504   ;;  %vm1566_vm10 = vcmask (!%p388_p2), 64512   ;;  %vm1613_vm11 = vcmask (!%p388_p2), 97280   ;;  %vm2912_vm12 = vcmask (!%p388_p2), 130048  }
   0xb   : > { %453 = vst.msk [vmem:[#allocation2 + $0x50] sm:$0xff] (!%p388_p2), %vm442_vm1, %v3522_v50  ;;  %454 = vst.msk [vmem:[#allocation2 + $0x58] sm:$0xff] (!%p388_p2), %vm442_vm1, %v3522_v50 }
   0xc   : > { %455 = vst.msk [vmem:[#allocation2 + $0x60] sm:$0xff] (!%p388_p2), %vm442_vm1, %v3522_v50  ;;  %456 = vst.msk [vmem:[#allocation2 + $0x68] sm:$0xff] (!%p388_p2), %vm442_vm1, %v3522_v50 }
   0xd   : > { %s4734_s26 = smov (!%p431_p3, %s3000_s26), 1  ;;  %457 = vst.msk [vmem:[#allocation2 + $0x70] sm:$0xff] %vm442_vm1, %v3522_v50  ;;  %458 = vst.msk [vmem:[#allocation2 + $0x78] sm:$0xff] %vm442_vm1, %v3522_v50 }
   0xe   : > { %s3122_s29 = sshll.u32 %s4734_s26, 8  ;;  %459 = vst.msk [vmem:[#allocation2 + $0x80] sm:$0xff] %vm442_vm1, %v3522_v50  ;;  %460 = vst.msk [vmem:[#allocation2 + $0x88] sm:$0xff] %vm442_vm1, %v3522_v50 }
   0xf   : > { %s3616_s15 = scalar_lea.vmem %s4715_s0, %s3122_s29  ;;  %461 = vst.msk [vmem:[#allocation2 + $0x90] sm:$0xff] %vm442_vm1, %v3522_v50  ;;  %462 = vst.msk [vmem:[#allocation2 + $0x98] sm:$0xff] %vm442_vm1, %v3522_v50  ;;  %s4507_s18 = scalar_lea.vmem %s4728_s13, %s3122_s29 }
  0x10   : > { %v479_v2 = vld [vmem:[%s3616_s15] sm:$0xff]  ;;  %v480_v3 = vld [vmem:[%s3616_s15 + $0x8] sm:$0xff]  ;;  %v481_v4 = vld [vmem:[%s3616_s15 + $0x10] sm:$0xff]  ;;  %463 = vst.msk [vmem:[#allocation2 + $0xa0] sm:$0xff] %vm442_vm1, %v3522_v50 }
  0x11   : > { %v3621_v5 = vpack.c.bf16 %v480_v3, %v479_v2  ;;  %v482_v6 = vld [vmem:[%s3616_s15 + $0x18] sm:$0xff]  ;;  %v483_v7 = vld [vmem:[%s3616_s15 + $0x20] sm:$0xff]  ;;  %v484_v8 = vld [vmem:[%s3616_s15 + $0x28] sm:$0xff]  ;;  %464 = vst.msk [vmem:[#allocation2 + $0xa8] sm:$0xff] %vm442_vm1, %v3522_v50 }
  0x12   : > { %v3626_v9 = vpack.c.bf16 %v482_v6, %v481_v4  ;;  %v3628_v10 = vpack.c.bf16 %v484_v8, %v483_v7  ;;  %v485_v11 = vld [vmem:[%s3616_s15 + $0x30] sm:$0xff]  ;;  %v486_v12 = vld [vmem:[%s3616_s15 + $0x38] sm:$0xff]  ;;  %v487_v13 = vld [vmem:[%s3616_s15 + $0x40] sm:$0xff]  ;;  %465 = vst.msk [vmem:[#allocation2 + $0xb0] sm:$0xff] %vm442_vm1, %v3522_v50 }
  0x13   : > { %3228 = vmatprep.mubr.msk.bf16.mxu0 %vm442_vm1, %v3621_v5  ;;  %v488_v14 = vld [vmem:[%s3616_s15 + $0x48] sm:$0xff]  ;;  %v3640_v15 = vpack.c.bf16 %v486_v12, %v485_v11  ;;  %v489_v17 = vld [vmem:[%s3616_s15 + $0x50] sm:$0xff]  ;;  %v490_v18 = vld [vmem:[%s3616_s15 + $0x58] sm:$0xff]  ;;  %466 = vst.msk [vmem:[#allocation2 + $0xb8] sm:$0xff] %vm442_vm1, %v3522_v50 }
  0x14   : > { %3229 = vmatmul.mubr.msk.bf16.vlgmr.msra.gmra.mrb[0].mxu0 %vm442_vm1, %v3626_v9  ;;  %v3642_v16 = vpack.c.bf16 %v488_v14, %v487_v13  ;;  %v491_v19 = vld [vmem:[%s3616_s15 + $0x60] sm:$0xff]  ;;  %v492_v20 = vld [vmem:[%s3616_s15 + $0x68] sm:$0xff]  ;;  %v3652_v21 = vpack.c.bf16 %v490_v18, %v489_v17  ;;  %v493_v23 = vld [vmem:[%s3616_s15 + $0x70] sm:$0xff]  ;;  %467 = vst.msk [vmem:[#allocation2 + $0xc0] sm:$0xff] %vm442_vm1, %v3522_v50 }
  0x15   : > { %3232 = vmatprep.mubr.msk.bf16.mxu0 %vm442_vm1, %v3628_v10  ;;  %v3654_v22 = vpack.c.bf16 %v492_v20, %v491_v19  ;;  %v494_v24 = vld [vmem:[%s3616_s15 + $0x78] sm:$0xff]  ;;  %v495_v25 = vld [vmem:[%s3616_s15 + $0x80] sm:$0xff]  ;;  %v496_v26 = vld [vmem:[%s3616_s15 + $0x88] sm:$0xff]  ;;  %468 = vst.msk [vmem:[#allocation2 + $0xc8] sm:$0xff] %vm442_vm1, %v3522_v50 }
  0x16   : > { %v3664_v27 = vpack.c.bf16 %v494_v24, %v493_v23  ;;  %v3666_v28 = vpack.c.bf16 %v496_v26, %v495_v25  ;;  %v497_v29 = vld [vmem:[%s3616_s15 + $0x90] sm:$0xff]  ;;  %v498_v30 = vld [vmem:[%s3616_s15 + $0x98] sm:$0xff]  ;;  %v499_v31 = vld [vmem:[%s3616_s15 + $0xa0] sm:$0xff]  ;;  %469 = vst.msk [vmem:[#allocation2 + $0xd0] sm:$0xff] %vm442_vm1, %v3522_v50 }
  0x17   : > { %v500_v32 = vld [vmem:[%s3616_s15 + $0xa8] sm:$0xff]  ;;  %v3676_v33 = vpack.c.bf16 %v498_v30, %v497_v29  ;;  %v501_v35 = vld [vmem:[%s3616_s15 + $0xb0] sm:$0xff]  ;;  %v502_v36 = vld [vmem:[%s3616_s15 + $0xb8] sm:$0xff]  ;;  %470 = vst.msk [vmem:[#allocation2 + $0xd8] sm:$0xff] %vm442_vm1, %v3522_v50 }
  0x18   : > { %v3678_v34 = vpack.c.bf16 %v500_v32, %v499_v31  ;;  %v503_v37 = vld [vmem:[%s3616_s15 + $0xc0] sm:$0xff]  ;;  %v504_v38 = vld [vmem:[%s3616_s15 + $0xc8] sm:$0xff]  ;;  %v3688_v39 = vpack.c.bf16 %v502_v36, %v501_v35  ;;  %v505_v41 = vld [vmem:[%s3616_s15 + $0xd0] sm:$0xff]  ;;  %471 = vst.msk [vmem:[#allocation2 + $0xe0] sm:$0xff] %vm442_vm1, %v3522_v50 }
  0x19   : > { %v3690_v40 = vpack.c.bf16 %v504_v38, %v503_v37  ;;  %v506_v42 = vld [vmem:[%s3616_s15 + $0xd8] sm:$0xff]  ;;  %v507_v43 = vld [vmem:[%s3616_s15 + $0xe0] sm:$0xff]  ;;  %v508_v44 = vld [vmem:[%s3616_s15 + $0xe8] sm:$0xff]  ;;  %472 = vst.msk [vmem:[#allocation2 + $0xe8] sm:$0xff] %vm442_vm1, %v3522_v50 }
  0x1a   : > { %v3700_v45 = vpack.c.bf16 %v506_v42, %v505_v41  ;;  %v3702_v46 = vpack.c.bf16 %v508_v44, %v507_v43  ;;  %v509_v47 = vld [vmem:[%s3616_s15 + $0xf0] sm:$0xff]  ;;  %v510_v48 = vld [vmem:[%s3616_s15 + $0xf8] sm:$0xff]  ;;  %473 = vst.msk [vmem:[#allocation2 + $0xf0] sm:$0xff] %vm442_vm1, %v3522_v50  ;;  %474 = vst.msk [vmem:[#allocation2 + $0xf8] sm:$0xff] %vm442_vm1, %v3522_v50 }
  0x1b   : > { %v3710_v49 = vpack.c.bf16 %v510_v48, %v509_v47  ;;  %475 = vst.msk [vmem:[#allocation2 + $0x100] sm:$0xff] %vm442_vm1, %v3522_v50  ;;  %476 = vst.msk [vmem:[#allocation2 + $0x108] sm:$0xff] %vm442_vm1, %v3522_v50  ;;  %v1027_v24 = vld [vmem:[#allocation2 + $0x28] sm:$0x1]  ;;  %v1021_v32 = vld [vmem:[#allocation2 + $0x18] sm:$0x1] }
  0x1c   : > { %3233 = vmatmul.mubr.msk.bf16.gmra.mrb[4].mxu0 %vm442_vm1, %v3640_v15  ;;  %477 = vst.msk [vmem:[#allocation2 + $0x110] sm:$0xff] %vm442_vm1, %v3522_v50  ;;  %478 = vst.msk [vmem:[#allocation2 + $0x118] sm:$0xff] %vm442_vm1, %v3522_v50  ;;  %v1024_v37 = vld [vmem:[#allocation2 + $0x20] sm:$0xff]  ;;  %v1015_v47 = vld [vmem:[#allocation2 + $0x10] sm:$0xff] }
  0x1d   : > { %3236 = vmatprep.mubr.msk.bf16.mxu0 %vm442_vm1, %v3642_v16  ;;  %vm3772_vm5 = vmand %vm1018_vm2, %vm1019_vm3 }
  0x1e   : > { %vm3780_vm6 = vmand %vm442_vm1, %vm1013_vm4 }
  0x24   : > { %3237 = vmatmul.mubr.msk.bf16.gmra.mrb[8].mxu0 %vm442_vm1, %v3652_v21 }
  0x25   : > { %3240 = vmatprep.mubr.msk.bf16.mxu0 %vm442_vm1, %v3654_v22 }
  0x2c   : > { %3241 = vmatmul.mubr.msk.bf16.gmra.mrb[12].mxu0 %vm442_vm1, %v3664_v27 }
  0x2d   : > { %3244 = vmatprep.mubr.msk.bf16.mxu0 %vm442_vm1, %v3666_v28 }
  0x34   : > { %3245 = vmatmul.mubr.msk.bf16.gmra.mrb[16].mxu0 %vm442_vm1, %v3676_v33 }
  0x35   : > { %3248 = vmatprep.mubr.msk.bf16.mxu0 %vm442_vm1, %v3678_v34 }
  0x3c   : > { %3249 = vmatmul.mubr.msk.bf16.gmra.mrb[20].mxu0 %vm442_vm1, %v3688_v39 }
  0x3d   : > { %3252 = vmatprep.mubr.msk.bf16.mxu0 %vm442_vm1, %v3690_v40 }
  0x44   : > { %3253 = vmatmul.mubr.msk.bf16.gmra.mrb[24].mxu0 %vm442_vm1, %v3700_v45 }
  0x45   : > { %3256 = vmatprep.mubr.msk.bf16.mxu0 %vm442_vm1, %v3702_v46 }
  0x4c   : > { %3257 = vmatmul.mubr.msk.bf16.gmra.mrb[28].mxu0 %vm442_vm1, %v3710_v49 }
  0xe7   : > { %v3230_v52 = vpop.f32.mrb[0].mxu0 }
  0xe8   : > { %v750_v54 = vmul.f32 %v3230_v52, %v3753_v51  ;;  %v614_v55 = vpop.f32.mrb[1].mxu0 }
  0xe9   : > { %v748_v56 = vmul.f32 %v3753_v51, %v614_v55  ;;  %v3231_v57 = vpop.f32.mrb[2].mxu0 }
  0xea   : > { %v789_v58 = vadd.f32 %v3758_v53, %v750_v54  ;;  %v751_v59 = vmul.f32 %v3231_v57, %v3753_v51  ;;  %v617_v60 = vpop.f32.mrb[3].mxu0 }
  0xeb   : > { %v787_v61 = vadd.f32 %v3758_v53, %v748_v56  ;;  %v749_v62 = vmul.f32 %v3753_v51, %v617_v60 }
  0xec   : > { %v790_v63 = vadd.f32 %v3758_v53, %v751_v59  ;;  %v821_v1 = vmax.f32 %v789_v58, 0.0 }
  0xed   : > { %v788_v0 = vadd.f32 %v3758_v53, %v749_v62  ;;  %v819_v3 = vmax.f32 %v787_v61, 0.0 }
  0xee   : > { %v822_v2 = vmax.f32 %v790_v63, 0.0 }
  0xef   : > { %v820_v4 = vmax.f32 %v788_v0, 0.0  ;;  %v3234_v6 = vpop.f32.mrb[4].mxu0 }
  0xf0   : > { %v852_v7 = vpack.c.bf16 %v822_v2, %v821_v1  ;;  %v754_v8 = vmul.f32 %v3234_v6, %v3753_v51  ;;  %v630_v11 = vpop.f32.mrb[5].mxu0 }
  0xf1   : > { %v851_v12 = vpack.c.bf16 %v820_v4, %v819_v3  ;;  %v752_v13 = vmul.f32 %v3753_v51, %v630_v11  ;;  %v3235_v14 = vpop.f32.mrb[6].mxu0  ;;  %v1039_v11 = vld [vmem:[#allocation2 + $0x48] sm:$0x1] }
  0xf2   : > { %v875_v17 = vshrl.u32 %v852_v7, 16  ;;  %v793_v18 = vadd.f32 %v3758_v53, %v754_v8  ;;  %v755_v19 = vmul.f32 %v3235_v14, %v3753_v51  ;;  %v633_v20 = vpop.f32.mrb[7].mxu0  ;;  %v878_v31 = vshll.u32 %v852_v7, 16 }
  0xf3   : > { %v868_v25 = vshrl.u32 %v851_v12, 16  ;;  %v791_v26 = vadd.f32 %v3758_v53, %v752_v13  ;;  %v753_v29 = vmul.f32 %v3753_v51, %v633_v20  ;;  %v871_v41 = vshll.u32 %v851_v12, 16 }
  0xf4   : > { %v877_v30 = vrot.slane %v875_v17, 7  ;;  %v794_v35 = vadd.f32 %v3758_v53, %v755_v19  ;;  %v825_v48 = vmax.f32 %v793_v18, 0.0  ;;  %v1033_v19 = vld [vmem:[#allocation2 + $0x38] sm:$0x1] }
  0xf5   : > { %v870_v38 = vrot.slane %v868_v25, 7  ;;  %v792_v42 = vadd.f32 %v3758_v53, %v753_v29  ;;  %v823_v55 = vmax.f32 %v791_v26, 0.0  ;;  %v1036_v26 = vld [vmem:[#allocation2 + $0x40] sm:$0xff] }
  0xf6   : > { %v880_v43 = vor.u32 %v878_v31, %v877_v30  ;;  %v1028_v44 = vsel %vm3772_vm5, %v877_v30, %v1027_v24  ;;  %v826_v50 = vmax.f32 %v794_v35, 0.0 }
  0xf7   : > { %1029 = vst [vmem:[#allocation2 + $0x28] sm:$0x1] %v1028_v44  ;;  %v873_v52 = vor.u32 %v871_v41, %v870_v38  ;;  %v1022_v54 = vsel %vm3772_vm5, %v870_v38, %v1021_v32  ;;  %v824_v56 = vmax.f32 %v792_v42, 0.0  ;;  %v3238_v57 = vpop.f32.mrb[8].mxu0  ;;  %v1030_v38 = vld [vmem:[#allocation2 + $0x30] sm:$0xff] }
  0xf8   : > { %v3791_v58 = vsel %vm3780_vm6, %v880_v43, %v1024_v37  ;;  %1023 = vst [vmem:[#allocation2 + $0x18] sm:$0x1] %v1022_v54  ;;  %v854_v59 = vpack.c.bf16 %v826_v50, %v825_v48  ;;  %v758_v60 = vmul.f32 %v3238_v57, %v3753_v51  ;;  %v646_v61 = vpop.f32.mrb[9].mxu0 }
  0xf9   : > { %1026 = vst [vmem:[#allocation2 + $0x20] sm:$0xff] %v3791_v58  ;;  %v3797_v62 = vsel %vm3780_vm6, %v873_v52, %v1015_v47  ;;  %v853_v63 = vpack.c.bf16 %v824_v56, %v823_v55  ;;  %v756_v0 = vmul.f32 %v3753_v51, %v646_v61  ;;  %v3239_v1 = vpop.f32.mrb[10].mxu0  ;;  %v1446_v2 = vrot.slane %v3791_v58, 1 }
  0xfa   : > { %1017 = vst [vmem:[#allocation2 + $0x10] sm:$0xff] %v3797_v62  ;;  %v889_v3 = vshrl.u32 %v854_v59, 16  ;;  %v892_v4 = vshll.u32 %v854_v59, 16  ;;  %v797_v6 = vadd.f32 %v3758_v53, %v758_v60  ;;  %v759_v7 = vmul.f32 %v3239_v1, %v3753_v51  ;;  %v649_v8 = vpop.f32.mrb[11].mxu0 }
  0xfb   : > { %v882_v12 = vshrl.u32 %v853_v63, 16  ;;  %v885_v13 = vshll.u32 %v853_v63, 16  ;;  %v795_v14 = vadd.f32 %v3758_v53, %v756_v0  ;;  %v757_v17 = vmul.f32 %v3753_v51, %v649_v8 }
  0xfc   : > { %v891_v18 = vrot.slane %v889_v3, 7  ;;  %v829_v20 = vmax.f32 %v797_v6, 0.0  ;;  %v798_v24 = vadd.f32 %v3758_v53, %v759_v7  ;;  %v1443_v25 = vrot.slane %v3797_v62, 1 }
  0xfd   : > { %v884_v29 = vrot.slane %v882_v12, 7  ;;  %v827_v30 = vmax.f32 %v795_v14, 0.0  ;;  %v796_v31 = vadd.f32 %v3758_v53, %v757_v17  ;;  %v1164_v32 = vshrl.u32 %v3797_v62, 16  ;;  %v1051_v12 = vld [vmem:[#allocation2 + $0x68] sm:$0x1] }
  0xfe   : > { %v894_v35 = vor.u32 %v892_v4, %v891_v18  ;;  %v1040_v37 = vsel %vm3772_vm5, %v891_v18, %v1039_v11  ;;  %v830_v41 = vmax.f32 %v798_v24, 0.0  ;;  %v3812_v42 = vld [vmem:[#allocation2 + $0x28] sm:$0xff]  ;;  %v1166_v43 = vshll.u32 %v3797_v62, 16 }
  0xff   : > { %1041 = vst [vmem:[#allocation2 + $0x48] sm:$0x1] %v1040_v37  ;;  %v887_v44 = vor.u32 %v885_v13, %v884_v29  ;;  %v1034_v47 = vsel %vm3772_vm5, %v884_v29, %v1033_v19  ;;  %v828_v48 = vmax.f32 %v796_v31, 0.0  ;;  %v3242_v50 = vpop.f32.mrb[12].mxu0  ;;  %v1117_v52 = vld [vmem:[#allocation2 + $0x18] sm:$0xff]  ;;  %v1447_v54 = vrot.slane %v3812_v42, 1 }
 0x100   : > { %v3820_v55 = vsel %vm3780_vm6, %v894_v35, %v1036_v26  ;;  %1035 = vst [vmem:[#allocation2 + $0x38] sm:$0x1] %v1034_v47  ;;  %v856_v56 = vpack.c.bf16 %v830_v41, %v829_v20  ;;  %v762_v57 = vmul.f32 %v3242_v50, %v3753_v51  ;;  %v662_v59 = vpop.f32.mrb[13].mxu0  ;;  %v1444_v60 = vrot.slane %v1117_v52, 1  ;;  %v1045_v20 = vld [vmem:[#allocation2 + $0x58] sm:$0x1] }
 0x101   : > { %1038 = vst [vmem:[#allocation2 + $0x40] sm:$0xff] %v3820_v55  ;;  %v3826_v61 = vsel %vm3780_vm6, %v887_v44, %v1030_v38  ;;  %v855_v63 = vpack.c.bf16 %v828_v48, %v827_v30  ;;  %v760_v0 = vmul.f32 %v3753_v51, %v662_v59  ;;  %v3243_v1 = vpop.f32.mrb[14].mxu0  ;;  %v1448_v3 = vsel %vm1439_vm7, %v1446_v2, %v1447_v54  ;;  %v1048_v29 = vld [vmem:[#allocation2 + $0x60] sm:$0xff]  ;;  %v1042_v44 = vld [vmem:[#allocation2 + $0x50] sm:$0xff] }
 0x102   : > { %1032 = vst [vmem:[#allocation2 + $0x30] sm:$0xff] %v3826_v61  ;;  %v903_v4 = vshrl.u32 %v856_v56, 16  ;;  %v906_v6 = vshll.u32 %v856_v56, 16  ;;  %v801_v7 = vadd.f32 %v3758_v53, %v762_v57  ;;  %v763_v8 = vmul.f32 %v3243_v1, %v3753_v51  ;;  %v665_v11 = vpop.f32.mrb[15].mxu0 }
 0x103   : > { %v896_v13 = vshrl.u32 %v855_v63, 16  ;;  %v899_v14 = vshll.u32 %v855_v63, 16  ;;  %v799_v17 = vadd.f32 %v3758_v53, %v760_v0  ;;  %v761_v18 = vmul.f32 %v3753_v51, %v665_v11 }
 0x104   : > { %v905_v19 = vrot.slane %v903_v4, 7  ;;  %v833_v24 = vmax.f32 %v801_v7, 0.0  ;;  %v802_v2 = vadd.f32 %v3758_v53, %v763_v8  ;;  %v1445_v26 = vsel %vm1439_vm7, %v1443_v25, %v1444_v60 }
 0x105   : > { %v898_v30 = vrot.slane %v896_v13, 7  ;;  %v831_v31 = vmax.f32 %v799_v17, 0.0  ;;  %v800_v35 = vadd.f32 %v3758_v53, %v761_v18  ;;  %1496 = vrot.lane.b32.xlu1 %v1445_v26, %s3523_s20  ;;  %v1168_v37 = vrot.slane %v1166_v43, 1 }
 0x106   : > { %v908_v38 = vor.u32 %v906_v6, %v905_v19  ;;  %v1052_v41 = vsel %vm3772_vm5, %v905_v19, %v1051_v12  ;;  %v834_v47 = vmax.f32 %v802_v2, 0.0  ;;  %v1171_v48 = vshll.u32 %v1117_v52, 16 }
 0x107   : > { %1053 = vst [vmem:[#allocation2 + $0x68] sm:$0x1] %v1052_v41  ;;  %v901_v50 = vor.u32 %v899_v14, %v898_v30  ;;  %v1046_v25 = vsel %vm3772_vm5, %v898_v30, %v1045_v20  ;;  %v832_v54 = vmax.f32 %v800_v35, 0.0  ;;  %v3246_v56 = vpop.f32.mrb[16].mxu0  ;;  %v1169_v57 = vor.u32 %v1168_v37, %v1164_v32  ;;  %v1063_v14 = vld [vmem:[#allocation2 + $0x88] sm:$0x1] }
 0x108   : > { %v3845_v59 = vsel %vm3780_vm6, %v908_v38, %v1048_v29  ;;  %1047 = vst [vmem:[#allocation2 + $0x58] sm:$0x1] %v1046_v25  ;;  %v858_v43 = vpack.c.bf16 %v834_v47, %v833_v24  ;;  %v766_v60 = vmul.f32 %v3246_v56, %v3753_v51  ;;  %v678_v63 = vpop.f32.mrb[17].mxu0  ;;  %v1173_v0 = vrot.slane %v1171_v48, 1  ;;  %v1057_v24 = vld [vmem:[#allocation2 + $0x78] sm:$0x1] }
 0x109   : > { %1050 = vst [vmem:[#allocation2 + $0x60] sm:$0xff] %v3845_v59  ;;  %v3851_v52 = vsel %vm3780_vm6, %v901_v50, %v1042_v44  ;;  %v857_v1 = vpack.c.bf16 %v832_v54, %v831_v31  ;;  %v764_v4 = vmul.f32 %v3753_v51, %v678_v63  ;;  %1498 = vrot.lane.b32.xlu1 %v1448_v3, %s3523_s20  ;;  %v3247_v32 = vpop.f32.mrb[18].mxu0  ;;  %v1176_v6 = vshrl.u32 %v3791_v58, 16  ;;  %v1060_v30 = vld [vmem:[#allocation2 + $0x80] sm:$0xff]  ;;  %v1054_v47 = vld [vmem:[#allocation2 + $0x70] sm:$0xff] }
 0x10a   : > { %1044 = vst [vmem:[#allocation2 + $0x50] sm:$0xff] %v3851_v52  ;;  %v917_v7 = vshrl.u32 %v858_v43, 16  ;;  %v920_v8 = vshll.u32 %v858_v43, 16  ;;  %v805_v11 = vadd.f32 %v3758_v53, %v766_v60  ;;  %v1174_v12 = vsel %vm1150_vm8, %v1169_v57, %v1173_v0  ;;  %v681_v13 = vpop.f32.mrb[19].mxu0  ;;  %v3871_v60 = vld [vmem:[#allocation2 + $0x48] sm:$0xff] }
 0x10b   : > { %v910_v17 = vshrl.u32 %v857_v1, 16  ;;  %v913_v18 = vshll.u32 %v857_v1, 16  ;;  %v803_v19 = vadd.f32 %v3758_v53, %v764_v4  ;;  %1369 = vrot.lane.b32.xlu0 %v1174_v12, %s3524_s21  ;;  %v767_v3 = vmul.f32 %v3247_v32, %v3753_v51 }
 0x10c   : > { %v919_v20 = vrot.slane %v917_v7, 7  ;;  %v837_v2 = vmax.f32 %v805_v11, 0.0  ;;  %v765_v26 = vmul.f32 %v3753_v51, %v681_v13  ;;  %v1178_v29 = vshll.u32 %v3791_v58, 16 }
 0x10d   : > { %v912_v31 = vrot.slane %v910_v17, 7  ;;  %v835_v35 = vmax.f32 %v803_v19, 0.0  ;;  %v806_v37 = vadd.f32 %v3758_v53, %v767_v3  ;;  %v1183_v38 = vshll.u32 %v3812_v42, 16 }
 0x10e   : > { %v922_v41 = vor.u32 %v920_v8, %v919_v20  ;;  %v1064_v44 = vsel %vm3772_vm5, %v919_v20, %v1063_v14  ;;  %v804_v48 = vadd.f32 %v3758_v53, %v765_v26  ;;  %v1180_v50 = vrot.slane %v1178_v29, 1  ;;  %v1075_v26 = vld [vmem:[#allocation2 + $0xa8] sm:$0x1] }
 0x10f   : > { %1065 = vst [vmem:[#allocation2 + $0x88] sm:$0x1] %v1064_v44  ;;  %v915_v25 = vor.u32 %v913_v18, %v912_v31  ;;  %v1058_v54 = vsel %vm3772_vm5, %v912_v31, %v1057_v24  ;;  %v838_v56 = vmax.f32 %v806_v37, 0.0  ;;  %v1185_v57 = vrot.slane %v1183_v38, 1  ;;  %v3250_v43 = vpop.f32.mrb[20].mxu0  ;;  %v1121_v24 = vld [vmem:[#allocation2 + $0x38] sm:$0xff] }
 0x110   : > { %v3875_v42 = vsel %vm3780_vm6, %v922_v41, %v1060_v30  ;;  %1059 = vst [vmem:[#allocation2 + $0x78] sm:$0x1] %v1058_v54  ;;  %v836_v63 = vmax.f32 %v804_v48, 0.0  ;;  %v1181_v0 = vor.u32 %v1180_v50, %v1176_v6  ;;  %v770_v1 = vmul.f32 %v3250_v43, %v3753_v51  ;;  %v694_v4 = vpop.f32.mrb[21].mxu0  ;;  %v1069_v37 = vld [vmem:[#allocation2 + $0x98] sm:$0x1] }
 0x111   : > { %1062 = vst [vmem:[#allocation2 + $0x80] sm:$0xff] %v3875_v42  ;;  %v3881_v32 = vsel %vm3780_vm6, %v915_v25, %v1054_v47  ;;  %v860_v7 = vpack.c.bf16 %v838_v56, %v837_v2  ;;  %v1202_v8 = vshll.u32 %v3820_v55, 16  ;;  %v3251_v11 = vpop.f32.mrb[22].mxu0  ;;  %v1207_v14 = vshll.u32 %v3871_v60, 16  ;;  %v1072_v47 = vld [vmem:[#allocation2 + $0xa0] sm:$0xff]  ;;  %v1066_v43 = vld [vmem:[#allocation2 + $0x90] sm:$0xff] }
 0x112   : > { %1056 = vst [vmem:[#allocation2 + $0x70] sm:$0xff] %v3881_v32  ;;  %v859_v12 = vpack.c.bf16 %v836_v63, %v835_v35  ;;  %v1186_v13 = vsel %vm1150_vm8, %v1181_v0, %v1185_v57  ;;  %v809_v6 = vadd.f32 %v3758_v53, %v770_v1  ;;  %v697_v17 = vpop.f32.mrb[23].mxu0  ;;  %v1200_v19 = vshrl.u32 %v3820_v55, 16 }
 0x113   : > { %v931_v18 = vshrl.u32 %v860_v7, 16  ;;  %1371 = vrot.lane.b32.xlu0 %v1186_v13, %s3524_s21  ;;  %v1204_v3 = vrot.slane %v1202_v8, 1  ;;  %v768_v20 = vmul.f32 %v3753_v51, %v694_v4  ;;  %v934_v2 = vshll.u32 %v860_v7, 16 }
 0x114   : > { %v924_v29 = vshrl.u32 %v859_v12, 16  ;;  %v927_v30 = vshll.u32 %v859_v12, 16  ;;  %v1209_v31 = vrot.slane %v1207_v14, 1  ;;  %v841_v38 = vmax.f32 %v809_v6, 0.0 }
 0x115   : > { %v933_v35 = vrot.slane %v931_v18, 7  ;;  %v1205_v41 = vor.u32 %v1204_v3, %v1200_v19  ;;  %v807_v44 = vadd.f32 %v3758_v53, %v768_v20  ;;  %v1190_v50 = vshll.u32 %v3826_v61, 16 }
 0x116   : > { %v926_v48 = vrot.slane %v924_v29, 7  ;;  %v1195_v25 = vshll.u32 %v1121_v24, 16  ;;  %v771_v54 = vmul.f32 %v3251_v11, %v3753_v51  ;;  %v1188_v0 = vshrl.u32 %v3826_v61, 16 }
 0x117   : > { %v936_v56 = vor.u32 %v934_v2, %v933_v35  ;;  %v1076_v57 = vsel %vm3772_vm5, %v933_v35, %v1075_v26  ;;  %v1210_v63 = vsel %vm1150_vm8, %v1205_v41, %v1209_v31  ;;  %v3254_v1 = vpop.f32.mrb[24].mxu0  ;;  %v1192_v8 = vrot.slane %v1190_v50, 1 }
 0x118   : > { %1077 = vst [vmem:[#allocation2 + $0xa8] sm:$0x1] %v1076_v57  ;;  %v929_v4 = vor.u32 %v927_v30, %v926_v48  ;;  %v1070_v7 = vsel %vm3772_vm5, %v926_v48, %v1069_v37  ;;  %1375 = vrot.lane.b32.xlu1 %v1210_v63, %s3524_s21  ;;  %v1197_v12 = vrot.slane %v1195_v25, 1  ;;  %v710_v11 = vpop.f32.mrb[25].mxu0  ;;  %v839_v6 = vmax.f32 %v807_v44, 0.0  ;;  %v3917_v37 = vld [vmem:[#allocation2 + $0x68] sm:$0xff] }
 0x119   : > { %v3903_v13 = vsel %vm3780_vm6, %v936_v56, %v1072_v47  ;;  %1071 = vst [vmem:[#allocation2 + $0x98] sm:$0x1] %v1070_v7  ;;  %v810_v14 = vadd.f32 %v3758_v53, %v771_v54  ;;  %v769_v18 = vmul.f32 %v3753_v51, %v697_v17  ;;  %v3255_v19 = vpop.f32.mrb[26].mxu0  ;;  %v1193_v20 = vor.u32 %v1192_v8, %v1188_v0  ;;  %v3930_v63 = vld [vmem:[#allocation2 + $0x58] sm:$0xff]  ;;  %v1087_v8 = vld [vmem:[#allocation2 + $0xc8] sm:$0x1] }
 0x11a   : > { %1074 = vst [vmem:[#allocation2 + $0xa0] sm:$0xff] %v3903_v13  ;;  %v3910_v3 = vsel %vm3780_vm6, %v929_v4, %v1066_v43  ;;  %v1452_v2 = vrot.slane %v3820_v55, 1  ;;  %v1453_v26 = vrot.slane %v3871_v60, 1  ;;  %v713_v29 = vpop.f32.mrb[27].mxu0  ;;  %v1450_v35 = vrot.slane %v1121_v24, 1 }
 0x11b   : > { %1068 = vst [vmem:[#allocation2 + $0x90] sm:$0xff] %v3910_v3  ;;  %v842_v30 = vmax.f32 %v810_v14, 0.0  ;;  %v808_v31 = vadd.f32 %v3758_v53, %v769_v18  ;;  %v774_v17 = vmul.f32 %v3254_v1, %v3753_v51  ;;  %v1198_v41 = vsel %vm1150_vm8, %v1193_v20, %v1197_v12 }
 0x11c   : > { %v1454_v44 = vsel %vm1439_vm7, %v1452_v2, %v1453_v26  ;;  %v1449_v47 = vrot.slane %v3826_v61, 1  ;;  %v1226_v48 = vshll.u32 %v3845_v59, 16  ;;  %1373 = vrot.lane.b32.xlu0 %v1198_v41, %s3524_s21  ;;  %v1224_v25 = vshrl.u32 %v3845_v59, 16  ;;  %v1081_v41 = vld [vmem:[#allocation2 + $0xb8] sm:$0x1] }
 0x11d   : > { %v862_v60 = vpack.c.bf16 %v842_v30, %v841_v38  ;;  %v840_v50 = vmax.f32 %v808_v31, 0.0  ;;  %1502 = vrot.lane.b32.xlu1 %v1454_v44, %s3523_s20  ;;  %v813_v24 = vadd.f32 %v3758_v53, %v774_v17  ;;  %v1231_v57 = vshll.u32 %v3917_v37, 16 }
 0x11e   : > { %v1451_v54 = vsel %vm1439_vm7, %v1449_v47, %v1450_v35  ;;  %v1228_v56 = vrot.slane %v1226_v48, 1  ;;  %v772_v43 = vmul.f32 %v3753_v51, %v710_v11  ;;  %v1212_v38 = vshrl.u32 %v3851_v52, 16 }
 0x11f   : > { %v945_v0 = vshrl.u32 %v862_v60, 16  ;;  %v948_v1 = vshll.u32 %v862_v60, 16  ;;  %v861_v4 = vpack.c.bf16 %v840_v50, %v839_v6  ;;  %v3258_v7 = vpop.f32.mrb[28].mxu0  ;;  %v845_v12 = vmax.f32 %v813_v24, 0.0  ;;  %v1084_v6 = vld [vmem:[#allocation2 + $0xc0] sm:$0xff] }
 0x120   : > { %v1229_v14 = vor.u32 %v1228_v56, %v1224_v25  ;;  %v1233_v18 = vrot.slane %v1231_v57, 1  ;;  %v1214_v20 = vshll.u32 %v3851_v52, 16  ;;  %v726_v2 = vpop.f32.mrb[29].mxu0  ;;  %1500 = vrot.lane.b32.xlu0 %v1451_v54, %s3523_s20  ;;  %v811_v11 = vadd.f32 %v3758_v53, %v772_v43  ;;  %v1078_v56 = vld [vmem:[#allocation2 + $0xb0] sm:$0xff] }
 0x121   : > { %v947_v26 = vrot.slane %v945_v0, 7  ;;  %v938_v30 = vshrl.u32 %v861_v4, 16  ;;  %v1219_v31 = vshll.u32 %v3930_v63, 16  ;;  %v3937_v35 = vpop.f32.mrb[30].mxu0  ;;  %v941_v17 = vshll.u32 %v861_v4, 16 }
 0x122   : > { %v1234_v44 = vsel %vm1150_vm8, %v1229_v14, %v1233_v18  ;;  %v1216_v47 = vrot.slane %v1214_v20, 1  ;;  %v775_v48 = vmul.f32 %v3255_v19, %v3753_v51  ;;  %v3941_v60 = vpop.f32.mrb[31].mxu0  ;;  %v773_v0 = vmul.f32 %v3753_v51, %v713_v29 }
 0x123   : > { %v950_v50 = vor.u32 %v948_v1, %v947_v26  ;;  %v1088_v24 = vsel %vm3772_vm5, %v947_v26, %v1087_v8  ;;  %v940_v25 = vrot.slane %v938_v30, 7  ;;  %1379 = vrot.lane.b32.xlu1 %v1234_v44, %s3524_s21  ;;  %v1221_v54 = vrot.slane %v1219_v31, 1  ;;  %v3959_v26 = vld [vmem:[#allocation2 + $0x88] sm:$0xff] }
 0x124   : > { %1089 = vst [vmem:[#allocation2 + $0xc8] sm:$0x1] %v1088_v24  ;;  %v1217_v57 = vor.u32 %v1216_v47, %v1212_v38  ;;  %v814_v43 = vadd.f32 %v3758_v53, %v775_v48  ;;  %v1458_v4 = vrot.slane %v3845_v59, 1  ;;  %v1459_v14 = vrot.slane %v3917_v37, 1 }
 0x125   : > { %v3951_v19 = vsel %vm3780_vm6, %v950_v50, %v1084_v6  ;;  %v943_v1 = vor.u32 %v941_v17, %v940_v25  ;;  %v1082_v8 = vsel %vm3772_vm5, %v940_v25, %v1081_v41  ;;  %v843_v38 = vmax.f32 %v811_v11, 0.0 }
 0x126   : > { %1086 = vst [vmem:[#allocation2 + $0xc0] sm:$0xff] %v3951_v19  ;;  %1083 = vst [vmem:[#allocation2 + $0xb8] sm:$0x1] %v1082_v8  ;;  %v1222_v18 = vsel %vm1150_vm8, %v1217_v57, %v1221_v54  ;;  %v846_v20 = vmax.f32 %v814_v43, 0.0  ;;  %v812_v29 = vadd.f32 %v3758_v53, %v773_v0  ;;  %v1460_v31 = vsel %vm1439_vm7, %v1458_v4, %v1459_v14  ;;  %v1129_v54 = vld [vmem:[#allocation2 + $0x78] sm:$0xff] }
 0x127   : > { %v3963_v30 = vsel %vm3780_vm6, %v943_v1, %v1078_v56  ;;  %1377 = vrot.lane.b32.xlu0 %v1222_v18, %s3524_s21  ;;  %v1456_v37 = vrot.slane %v3930_v63, 1  ;;  %v778_v6 = vmul.f32 %v3258_v7, %v3753_v51  ;;  %1506 = vrot.lane.b32.xlu1 %v1460_v31, %s3523_s20  ;;  %v1455_v41 = vrot.slane %v3851_v52, 1  ;;  %v1099_v57 = vld [vmem:[#allocation2 + $0xe8] sm:$0x1] }
 0x128   : > { %1080 = vst [vmem:[#allocation2 + $0xb0] sm:$0xff] %v3963_v30  ;;  %v864_v11 = vpack.c.bf16 %v846_v20, %v845_v12  ;;  %v844_v17 = vmax.f32 %v812_v29, 0.0  ;;  %v1250_v44 = vshll.u32 %v3875_v42, 16  ;;  %v1248_v48 = vshrl.u32 %v3875_v42, 16 }
 0x129   : > { %v817_v47 = vadd.f32 %v3758_v53, %v778_v6  ;;  %v1255_v50 = vshll.u32 %v3959_v26, 16  ;;  %v776_v63 = vmul.f32 %v3753_v51, %v726_v2  ;;  %v1457_v25 = vsel %vm1439_vm7, %v1455_v41, %v1456_v37  ;;  %v1096_v2 = vld [vmem:[#allocation2 + $0xe0] sm:$0xff] }
 0x12a   : > { %v959_v24 = vshrl.u32 %v864_v11, 16  ;;  %v863_v7 = vpack.c.bf16 %v844_v17, %v843_v38  ;;  %v1252_v12 = vrot.slane %v1250_v44, 1  ;;  %v962_v56 = vshll.u32 %v864_v11, 16  ;;  %v1093_v38 = vld [vmem:[#allocation2 + $0xd8] sm:$0x1]  ;;  %v1090_v44 = vld [vmem:[#allocation2 + $0xd0] sm:$0xff] }
 0x12b   : > { %1504 = vrot.lane.b32.xlu0 %v1457_v25, %s3523_s20  ;;  %v849_v43 = vmax.f32 %v817_v47, 0.0  ;;  %v1257_v0 = vrot.slane %v1255_v50, 1  ;;  %v815_v4 = vadd.f32 %v3758_v53, %v776_v63  ;;  %v1236_v18 = vshrl.u32 %v3881_v32, 16 }
 0x12c   : > { %v961_v1 = vrot.slane %v959_v24, 7  ;;  %v952_v8 = vshrl.u32 %v863_v7, 16  ;;  %v1253_v14 = vor.u32 %v1252_v12, %v1248_v48  ;;  %v955_v20 = vshll.u32 %v863_v7, 16 }
 0x12d   : > { %v1238_v29 = vshll.u32 %v3881_v32, 16  ;;  %v1243_v31 = vshll.u32 %v1129_v54, 16  ;;  %v779_v37 = vmul.f32 %v3937_v35, %v3753_v51  ;;  %v777_v63 = vmul.f32 %v3753_v51, %v3941_v60  ;;  %v4001_v51 = vld [vmem:[#allocation2 + $0xa8] sm:$0xff] }
 0x12e   : > { %v964_v6 = vor.u32 %v962_v56, %v961_v1  ;;  %v1100_v11 = vsel %vm3772_vm5, %v961_v1, %v1099_v57  ;;  %v954_v17 = vrot.slane %v952_v8, 7  ;;  %v1258_v41 = vsel %vm1150_vm8, %v1253_v14, %v1257_v0 }
 0x12f   : > { %1101 = vst [vmem:[#allocation2 + $0xe8] sm:$0x1] %v1100_v11  ;;  %1383 = vrot.lane.b32.xlu1 %v1258_v41, %s3524_s21  ;;  %v1240_v47 = vrot.slane %v1238_v29, 1  ;;  %v1245_v48 = vrot.slane %v1243_v31, 1  ;;  %v818_v50 = vadd.f32 %v3758_v53, %v779_v37  ;;  %v1464_v25 = vrot.slane %v3875_v42, 1 }
 0x130   : > { %v3993_v35 = vsel %vm3780_vm6, %v964_v6, %v1096_v2  ;;  %v957_v24 = vor.u32 %v955_v20, %v954_v17  ;;  %v1094_v7 = vsel %vm3772_vm5, %v954_v17, %v1093_v38  ;;  %v816_v57 = vadd.f32 %v3758_v53, %v777_v63  ;;  %v1133_v38 = vld [vmem:[#allocation2 + $0x98] sm:$0xff]  ;;  %v1111_v6 = vld [vmem:[#allocation2 + $0x108] sm:$0x1] }
 0x131   : > { %1098 = vst [vmem:[#allocation2 + $0xe0] sm:$0xff] %v3993_v35  ;;  %1095 = vst [vmem:[#allocation2 + $0xd8] sm:$0x1] %v1094_v7  ;;  %v1241_v12 = vor.u32 %v1240_v47, %v1236_v18  ;;  %v850_v56 = vmax.f32 %v818_v50, 0.0  ;;  %v1465_v0 = vrot.slane %v3959_v26, 1  ;;  %v847_v1 = vmax.f32 %v815_v4, 0.0 }
 0x132   : > { %v4005_v60 = vsel %vm3780_vm6, %v957_v24, %v1090_v44  ;;  %v1461_v8 = vrot.slane %v3881_v32, 1  ;;  %v1462_v14 = vrot.slane %v1129_v54, 1  ;;  %v848_v20 = vmax.f32 %v816_v57, 0.0  ;;  %v1108_v24 = vld [vmem:[#allocation2 + $0x100] sm:$0xff] }
 0x133   : > { %1092 = vst [vmem:[#allocation2 + $0xd0] sm:$0xff] %v4005_v60  ;;  %v1246_v2 = vsel %vm1150_vm8, %v1241_v12, %v1245_v48  ;;  %v866_v18 = vpack.c.bf16 %v850_v56, %v849_v43  ;;  %v1466_v53 = vsel %vm1439_vm7, %v1464_v25, %v1465_v0  ;;  %v1272_v26 = vshrl.u32 %v3903_v13, 16  ;;  %v1105_v25 = vld [vmem:[#allocation2 + $0xf8] sm:$0x1] }
 0x134   : > { %1381 = vrot.lane.b32.xlu0 %v1246_v2, %s3524_s21  ;;  %1510 = vrot.lane.b32.xlu1 %v1466_v53, %s3523_s20  ;;  %v1274_v4 = vshll.u32 %v3903_v13, 16  ;;  %v1279_v29 = vshll.u32 %v4001_v51, 16  ;;  %v865_v31 = vpack.c.bf16 %v848_v20, %v847_v1  ;;  %v1463_v37 = vsel %vm1439_vm7, %v1461_v8, %v1462_v14  ;;  %v1139_v14 = vld [vmem:[#allocation2 + $0xc8] sm:$0xff]  ;;  %v1102_v2 = vld [vmem:[#allocation2 + $0xf0] sm:$0xff] }
 0x135   : > { %v973_v54 = vshrl.u32 %v866_v18, 16  ;;  %v1262_v43 = vshll.u32 %v3910_v3, 16  ;;  %v1260_v41 = vshrl.u32 %v3910_v3, 16  ;;  %v1267_v44 = vshll.u32 %v1133_v38, 16 }
 0x136   : > { %v1276_v11 = vrot.slane %v1274_v4, 1  ;;  %v1281_v17 = vrot.slane %v1279_v29, 1  ;;  %v976_v48 = vshll.u32 %v866_v18, 16  ;;  %v966_v50 = vshrl.u32 %v865_v31, 16  ;;  %v1137_v4 = vld [vmem:[#allocation2 + $0xb8] sm:$0xff] }
 0x137   : > { %v975_v47 = vrot.slane %v973_v54, 7  ;;  %v1264_v63 = vrot.slane %v1262_v43, 1  ;;  %v969_v7 = vshll.u32 %v865_v31, 16  ;;  %v1269_v56 = vrot.slane %v1267_v44, 1 }
 0x138   : > { %1508 = vrot.lane.b32.xlu0 %v1463_v37, %s3523_s20  ;;  %v1277_v12 = vor.u32 %v1276_v11, %v1272_v26  ;;  %v968_v1 = vrot.slane %v966_v50, 7  ;;  %v1471_v20 = vrot.slane %v4001_v51, 1  ;;  %v1468_v53 = vrot.slane %v1133_v38, 1 }
 0x139   : > { %v978_v57 = vor.u32 %v976_v48, %v975_v47  ;;  %v1112_v0 = vsel %vm3772_vm5, %v975_v47, %v1111_v6  ;;  %v1265_v8 = vor.u32 %v1264_v63, %v1260_v41  ;;  %v1470_v51 = vrot.slane %v3903_v13, 1 }
 0x13a   : > { %1113 = vst [vmem:[#allocation2 + $0x108] sm:$0x1] %v1112_v0  ;;  %v1282_v18 = vsel %vm1150_vm8, %v1277_v12, %v1281_v17  ;;  %v971_v26 = vor.u32 %v969_v7, %v968_v1  ;;  %v1106_v54 = vsel %vm3772_vm5, %v968_v1, %v1105_v25  ;;  %v1298_v38 = vshll.u32 %v3951_v19, 16  ;;  %v4042_v17 = vld [vmem:[#allocation2 + $0xe8] sm:$0xff]  ;;  %v4050_v7 = vld [vmem:[#allocation2 + $0xd8] sm:$0xff] }
 0x13b   : > { %v4026_v29 = vsel %vm3780_vm6, %v978_v57, %v1108_v24  ;;  %1387 = vrot.lane.b32.xlu1 %v1282_v18, %s3524_s21  ;;  %v1270_v31 = vsel %vm1150_vm8, %v1265_v8, %v1269_v56  ;;  %1107 = vst [vmem:[#allocation2 + $0xf8] sm:$0x1] %v1106_v54  ;;  %v1303_v37 = vshll.u32 %v1139_v14, 16  ;;  %v1467_v23 = vrot.slane %v3910_v3, 1 }
 0x13c   : > { %1110 = vst [vmem:[#allocation2 + $0x100] sm:$0xff] %v4026_v29  ;;  %1385 = vrot.lane.b32.xlu0 %v1270_v31, %s3524_s21  ;;  %v4038_v43 = vsel %vm3780_vm6, %v971_v26, %v1102_v2  ;;  %v1286_v6 = vshll.u32 %v3963_v30, 16  ;;  %v1291_v11 = vshll.u32 %v1137_v4, 16  ;;  %v1472_v41 = vsel %vm1439_vm7, %v1470_v51, %v1471_v20 }
 0x13d   : > { %1104 = vst [vmem:[#allocation2 + $0xf0] sm:$0xff] %v4038_v43  ;;  %v1296_v44 = vshrl.u32 %v3951_v19, 16  ;;  %v1300_v47 = vrot.slane %v1298_v38, 1  ;;  %v1305_v48 = vrot.slane %v1303_v37, 1  ;;  %v1469_v36 = vsel %vm1439_vm7, %v1467_v23, %v1468_v53 }
 0x13e   : > { %v1284_v50 = vshrl.u32 %v3963_v30, 16  ;;  %v1288_v63 = vrot.slane %v1286_v6, 1  ;;  %v1293_v24 = vrot.slane %v1291_v11, 1  ;;  %v1322_v12 = vshll.u32 %v3993_v35, 16 }
 0x13f   : > { %1514 = vrot.lane.b32.xlu1 %v1472_v41, %s3523_s20  ;;  %v1301_v25 = vor.u32 %v1300_v47, %v1296_v44  ;;  %v1327_v56 = vshll.u32 %v4042_v17, 16  ;;  %v1310_v0 = vshll.u32 %v4005_v60, 16  ;;  %v1477_v8 = vrot.slane %v1139_v14, 1 }
 0x140   : > { %1512 = vrot.lane.b32.xlu0 %v1469_v36, %s3523_s20  ;;  %v1289_v57 = vor.u32 %v1288_v63, %v1284_v50  ;;  %v1324_v2 = vrot.slane %v1322_v12, 1  ;;  %v1315_v18 = vshll.u32 %v4050_v7, 16  ;;  %v1474_v53 = vrot.slane %v1137_v4, 1  ;;  %v3511_v36 = vld [vmem:[%s4719_s4 + $0x8] sm:$0x3f]  }
 0x141   : > { %v1306_v1 = vsel %vm1150_vm8, %v1301_v25, %v1305_v48  ;;  %v1312_v26 = vrot.slane %v1310_v0, 1  ;;  %v1476_v54 = vrot.slane %v3951_v19, 1  ;;  %v1320_v31 = vshrl.u32 %v3993_v35, 16  ;;  %v1147_v23 = vld [vmem:[#allocation2 + $0x108] sm:$0xff]  ;;  %v4079_v12 = vld [vmem:[%s4719_s4] sm:$0x3f]   ;;  %3495 = vmatprep.subr.msk.bf16.mxu1 %vm1646_vm9, %v3511_v36 }
 0x142   : > { %v1294_v20 = vsel %vm1150_vm8, %v1289_v57, %v1293_v24  ;;  %v1329_v51 = vrot.slane %v1327_v56, 1  ;;  %v1473_v38 = vrot.slane %v3963_v30, 1  ;;  %v1308_v14 = vshrl.u32 %v4005_v60, 16  ;;  %v1145_v4 = vld [vmem:[#allocation2 + $0xf8] sm:$0xff]  ;;  %v4082_v0 = vld [vmem:[#allocation2] sm:$0xff] }
 0x143   : > { %1391 = vrot.lane.b32.xlu1 %v1306_v1, %s3524_s21  ;;  %v1317_v37 = vrot.slane %v1315_v18, 1  ;;  %v1478_v6 = vsel %vm1439_vm7, %v1476_v54, %v1477_v8  ;;  %v1325_v11 = vor.u32 %v1324_v2, %v1320_v31  ;;  %v1346_v41 = vshll.u32 %v4026_v29, 16 }
 0x144   : > { %1389 = vrot.lane.b32.xlu0 %v1294_v20, %s3524_s21  ;;  %v1475_v44 = vsel %vm1439_vm7, %v1473_v38, %v1474_v53  ;;  %v1313_v47 = vor.u32 %v1312_v26, %v1308_v14  ;;  %v1334_v48 = vshll.u32 %v4038_v43, 16  ;;  %v1351_v63 = vshll.u32 %v1147_v23, 16  ;;  %v1115_v38 = vld [vmem:[#allocation2 + $0x8] sm:$0xff] }
 0x145   : > { %v1330_v50 = vsel %vm1150_vm8, %v1325_v11, %v1329_v51  ;;  %v1339_v25 = vshll.u32 %v1145_v4, 16  ;;  %v1483_v56 = vrot.slane %v4042_v17, 1  ;;  %v1348_v57 = vrot.slane %v1346_v41, 1 }
 0x146   : > { %v1318_v24 = vsel %vm1150_vm8, %v1313_v47, %v1317_v37  ;;  %v1480_v1 = vrot.slane %v4050_v7, 1  ;;  %v1336_v8 = vrot.slane %v1334_v48, 1  ;;  %v1648_v2 = vsel %vm1646_vm9, %v3511_v36, 0  ;;  %v3513_v48 = vld [vmem:[%s4719_s4 + $0x10] sm:$0x3f]  }
 0x147   : > { %1518 = vrot.lane.b32.xlu1 %v1478_v6, %s3523_s20  ;;  %v1482_v18 = vrot.slane %v3993_v35, 1  ;;  %v1344_v20 = vshrl.u32 %v4026_v29, 16  ;;  %v1353_v17 = vrot.slane %v1351_v63, 1  ;;  %3261 = vmatpush3.bf16.msra.mxu1 %v1648_v2  ;;  %v1479_v53 = vrot.slane %v4005_v60, 1 }
 0x148   : > { %1516 = vrot.lane.b32.xlu0 %v1475_v44, %s3523_s20  ;;  %v1332_v26 = vshrl.u32 %v4038_v43, 16  ;;  %v1341_v54 = vrot.slane %v1339_v25, 1  ;;  %v1154_v7 = vshll.u32 %v4082_v0, 16  ;;  %3496 = vmatprep.subr.msk.bf16.mxu1 %vm1646_vm9, %v4079_v12  ;;  %v1152_v41 = vshrl.u32 %v4082_v0, 16 }
 0x149   : > { %v1484_v31 = vsel %vm1439_vm7, %v1482_v18, %v1483_v56  ;;  %v1349_v51 = vor.u32 %v1348_v57, %v1344_v20  ;;  %v1481_v14 = vsel %vm1439_vm7, %v1479_v53, %v1480_v1  ;;  %v1159_v47 = vshll.u32 %v1115_v38, 16  ;;  %v1149_v18 = vld [vmem:[#allocation2 + $0x118] sm:$0xff] }
 0x14a   : > { %v1337_v37 = vor.u32 %v1336_v8, %v1332_v26  ;;  %v1156_v44 = vrot.slane %v1154_v7, 1  ;;  %v1489_v36 = vrot.slane %v1147_v23, 1  ;;  %v1488_v63 = vrot.slane %v4026_v29, 1  ;;  %v4115_v23 = vld [vmem:[#allocation2 + $0x110] sm:$0xff] }
 0x14b   : > { %1395 = vrot.lane.b32.xlu1 %v1330_v50, %s3524_s21  ;;  %v1354_v6 = vsel %vm1150_vm8, %v1349_v51, %v1353_v17  ;;  %v1486_v50 = vrot.slane %v1145_v4, 1  ;;  %v1441_v25 = vrot.slane %v1115_v38, 1  ;;  %v1485_v56 = vrot.slane %v4038_v43, 1 }
 0x14c   : > { %1393 = vrot.lane.b32.xlu0 %v1318_v24, %s3524_s21  ;;  %v1342_v11 = vsel %vm1150_vm8, %v1337_v37, %v1341_v54  ;;  %v1440_v24 = vrot.slane %v4082_v0, 1  ;;  %v1157_v57 = vor.u32 %v1156_v44, %v1152_v41  ;;  %v1161_v1 = vrot.slane %v1159_v47, 1 }
 0x14d   : > { %v4112_v8 = vsel %vm1646_vm9, %v3513_v48, 0  ;;  %v1490_v2 = vsel %vm1439_vm7, %v1488_v63, %v1489_v36  ;;  %v1487_v4 = vsel %vm1439_vm7, %v1485_v56, %v1486_v50  ;;  %v1356_v20 = vshrl.u32 %v4115_v23, 16 }
 0x14e   : > { %v1358_v17 = vshll.u32 %v4115_v23, 16  ;;  %v1363_v53 = vshll.u32 %v1149_v18, 16  ;;  %v1442_v26 = vsel %vm1439_vm7, %v1440_v24, %v1441_v25  ;;  %v1491_v54 = vrot.slane %v4115_v23, 1 }
 0x14f   : > { %1522 = vrot.lane.b32.xlu1 %v1484_v31, %s3523_s20  ;;  %v1492_v7 = vrot.slane %v1149_v18, 1  ;;  %v1162_v31 = vsel %vm1150_vm8, %v1157_v57, %v1161_v1  ;;  %v1819_v24 = vsel %vm1646_vm9, %v4079_v12, 0 }
 0x150   : > { %1520 = vrot.lane.b32.xlu0 %v1481_v14, %s3523_s20  ;;  %v1360_v51 = vrot.slane %v1358_v17, 1  ;;  %v1365_v38 = vrot.slane %v1363_v53, 1 }
 0x151   : > { %v1493_v37 = vsel %vm1439_vm7, %v1491_v54, %v1492_v7 }
 0x152   : > { %v1361_v14 = vor.u32 %v1360_v51, %v1356_v20 }
 0x153   : > { %1399 = vrot.lane.b32.xlu1 %v1354_v6, %s3524_s21 }
 0x154   : > { %1397 = vrot.lane.b32.xlu0 %v1342_v11, %s3524_s21  ;;  %v1366_v6 = vsel %vm1150_vm8, %v1361_v14, %v1365_v38 }
 0x157   : > { %1526 = vrot.lane.b32.xlu1 %v1490_v2, %s3523_s20 }
 0x158   : > { %1524 = vrot.lane.b32.xlu0 %v1487_v4, %s3523_s20 }
 0x15b   : > { %1494 = vrot.lane.b32.xlu1 %v1442_v26, %s3523_s20 }
 0x15c   : > { %1367 = vrot.lane.b32.xlu0 %v1162_v31, %s3524_s21 }
 0x15f   : > { %1528 = vrot.lane.b32.xlu1 %v1493_v37, %s3523_s20 }
 0x160   : > { %1401 = vrot.lane.b32.xlu0 %v1366_v6, %s3524_s21 }
 0x177   : > { %v1497_v41 = vpop.permute.xlu1 %1496 }
 0x17b   : > { %v1499_v36 = vpop.permute.xlu1 %1498 }
 0x17d   : > { %v1370_v11 = vpop.permute.xlu0 %1369 }
 0x17e   : > { %v1533_v44 = vsel %vm442_vm1, %v3797_v62, %v1370_v11 }
 0x17f   : > { %v4134_v47 = vsel %vm1566_vm10, %v1533_v44, %v1497_v41 }
 0x180   : > { %3262 = vmatprep.mubr.msk.bf16.mxu1 %vm1613_vm11, %v4134_v47 }
 0x185   : > { %v1372_v50 = vpop.permute.xlu0 %1371 }
 0x186   : > { %v1535_v63 = vsel %vm442_vm1, %v3791_v58, %v1372_v50 }
 0x187   : > { %v4143_v25 = vsel %vm1566_vm10, %v1535_v63, %v1499_v36 }
 0x188   : > { %3263 = vmatmul.mubr.msk.bf16.vlgmr.msra.gmra.mrb[0].mxu1 %vm1613_vm11, %v4143_v25 }
 0x189   : > { %3295 = vmatpush3.bf16.msra.mxu1 %v1819_v24 }
 0x18a   : > { %v1376_v62 = vpop.permute.xlu1 %1375  ;;  %3497 = vmatprep.subr.msk.bf16.mxu1 %vm1646_vm9, %v3513_v48 }
 0x18b   : > { %v1539_v58 = vsel %vm442_vm1, %v3820_v55, %v1376_v62 }
 0x18e   : > { %v1374_v56 = vpop.permute.xlu0 %1373 }
 0x18f   : > { %v1503_v57 = vpop.permute.xlu1 %1502  ;;  %v1537_v1 = vsel %vm442_vm1, %v3826_v61, %v1374_v56 }
 0x190   : > { %v4156_v18 = vsel %vm1566_vm10, %v1539_v58, %v1503_v57 }
 0x192   : > { %v1501_v2 = vpop.permute.xlu0 %1500 }
 0x193   : > { %v4153_v12 = vsel %vm1566_vm10, %v1537_v1, %v1501_v2 }
 0x194   : > { %3266 = vmatprep.mubr.msk.bf16.mxu1 %vm1613_vm11, %v4153_v12 }
 0x195   : > { %v1380_v4 = vpop.permute.xlu1 %1379  ;;  %3267 = vmatmul.mubr.msk.bf16.gmra.mrb[4].mxu1 %vm1613_vm11, %v4156_v18 }
 0x196   : > { %v1543_v55 = vsel %vm442_vm1, %v3845_v59, %v1380_v4 }
 0x199   : > { %v1378_v48 = vpop.permute.xlu0 %1377  ;;  %v1507_v20 = vpop.permute.xlu1 %1506 }
 0x19a   : > { %v1541_v61 = vsel %vm442_vm1, %v3851_v52, %v1378_v48  ;;  %v4170_v26 = vsel %vm1566_vm10, %v1543_v55, %v1507_v20 }
 0x19d   : > { %v1505_v17 = vpop.permute.xlu0 %1504 }
 0x19e   : > { %v4167_v53 = vsel %vm1566_vm10, %v1541_v61, %v1505_v17 }
 0x19f   : > { %3270 = vmatprep.mubr.msk.bf16.mxu1 %vm1613_vm11, %v4167_v53 }
 0x1a0   : > { %3271 = vmatmul.mubr.msk.bf16.gmra.mrb[8].mxu1 %vm1613_vm11, %v4170_v26 }
 0x1a1   : > { %v1384_v54 = vpop.permute.xlu1 %1383 }
 0x1a2   : > { %v1547_v59 = vsel %vm442_vm1, %v3875_v42, %v1384_v54 }
 0x1a6   : > { %v1382_v7 = vpop.permute.xlu0 %1381  ;;  %v1511_v31 = vpop.permute.xlu1 %1510 }
 0x1a7   : > { %v1545_v52 = vsel %vm442_vm1, %v3881_v32, %v1382_v7  ;;  %v4184_v14 = vsel %vm1566_vm10, %v1547_v59, %v1511_v31 }
 0x1aa   : > { %v1509_v51 = vpop.permute.xlu0 %1508 }
 0x1ab   : > { %v4181_v38 = vsel %vm1566_vm10, %v1545_v52, %v1509_v51  ;;  %v2314_v51 = vld [vmem:[%s4722_s7] sm:$0x3] }
 0x1ac   : > { %3274 = vmatprep.mubr.msk.bf16.mxu1 %vm1613_vm11, %v4181_v38  ;;  %3498 = vmatprep.subr.msk.bf16.mxu0 %vm576_vm0, %v2314_v51 }
 0x1ad   : > { %3275 = vmatmul.mubr.msk.bf16.gmra.mrb[12].mxu1 %vm1613_vm11, %v4184_v14  ;;  %v1388_v37 = vpop.permute.xlu1 %1387 }
 0x1ae   : > { %v1386_v6 = vpop.permute.xlu0 %1385  ;;  %v1551_v42 = vsel %vm442_vm1, %v3903_v13, %v1388_v37 }
 0x1af   : > { %v1549_v32 = vsel %vm442_vm1, %v3910_v3, %v1386_v6 }
 0x1b1   : > { %v1515_v11 = vpop.permute.xlu1 %1514 }
 0x1b2   : > { %v1513_v41 = vpop.permute.xlu0 %1512  ;;  %v4198_v36 = vsel %vm1566_vm10, %v1551_v42, %v1515_v11 }
 0x1b3   : > { %v4195_v44 = vsel %vm1566_vm10, %v1549_v32, %v1513_v41 }
 0x1b4   : > { %3278 = vmatprep.mubr.msk.bf16.mxu1 %vm1613_vm11, %v4195_v44 }
 0x1b5   : > { %3279 = vmatmul.mubr.msk.bf16.gmra.mrb[16].mxu1 %vm1613_vm11, %v4198_v36  ;;  %v1392_v50 = vpop.permute.xlu1 %1391 }
 0x1b6   : > { %v1390_v63 = vpop.permute.xlu0 %1389  ;;  %v1555_v13 = vsel %vm442_vm1, %v3951_v19, %v1392_v50 }
 0x1b7   : > { %v1553_v3 = vsel %vm442_vm1, %v3963_v30, %v1390_v63 }
 0x1b9   : > { %v1519_v24 = vpop.permute.xlu1 %1518 }
 0x1ba   : > { %v1517_v62 = vpop.permute.xlu0 %1516  ;;  %v1592_v57 = vsel %vm1566_vm10, %v1555_v13, %v1519_v24 }
 0x1bb   : > { %v1590_v56 = vsel %vm1566_vm10, %v1553_v3, %v1517_v62 }
 0x1bc   : > { %3282 = vmatprep.mubr.msk.bf16.mxu1 %vm1613_vm11, %v1590_v56 }
 0x1bd   : > { %3283 = vmatmul.mubr.msk.bf16.gmra.mrb[20].mxu1 %vm1613_vm11, %v1592_v57  ;;  %v1396_v1 = vpop.permute.xlu1 %1395 }
 0x1be   : > { %v1394_v2 = vpop.permute.xlu0 %1393  ;;  %v1559_v30 = vsel %vm442_vm1, %v3993_v35, %v1396_v1 }
 0x1bf   : > { %v1557_v4 = vsel %vm442_vm1, %v4005_v60, %v1394_v2 }
 0x1c1   : > { %v1523_v58 = vpop.permute.xlu1 %1522 }
 0x1c2   : > { %v1521_v48 = vpop.permute.xlu0 %1520  ;;  %v1596_v20 = vsel %vm1566_vm10, %v1559_v30, %v1523_v58 }
 0x1c3   : > { %v1594_v19 = vsel %vm1566_vm10, %v1557_v4, %v1521_v48 }
 0x1c4   : > { %3286 = vmatprep.mubr.msk.bf16.mxu1 %vm1613_vm11, %v1594_v19 }
 0x1c5   : > { %3287 = vmatmul.mubr.msk.bf16.gmra.mrb[24].mxu1 %vm1613_vm11, %v1596_v20  ;;  %v1400_v61 = vpop.permute.xlu1 %1399 }
 0x1c6   : > { %v1398_v17 = vpop.permute.xlu0 %1397  ;;  %v1563_v60 = vsel %vm442_vm1, %v4026_v29, %v1400_v61 }
 0x1c7   : > { %v1561_v54 = vsel %vm442_vm1, %v4038_v43, %v1398_v17  ;;  %v2364_v43 = vsel %vm576_vm0, %v2314_v51, 0 }
 0x1c8   : > { %3363 = vmatpush3.bf16.msra.mxu0 %v2364_v43 }
 0x1c9   : > { %v1527_v55 = vpop.permute.xlu1 %1526 }
 0x1ca   : > { %v1525_v7 = vpop.permute.xlu0 %1524  ;;  %v1600_v31 = vsel %vm1566_vm10, %v1563_v60, %v1527_v55 }
 0x1cb   : > { %v1598_v35 = vsel %vm1566_vm10, %v1561_v54, %v1525_v7 }
 0x1cc   : > { %3290 = vmatprep.mubr.msk.bf16.mxu1 %vm1613_vm11, %v1598_v35 }
 0x1cd   : > { %3291 = vmatmul.mubr.msk.bf16.gmra.mrb[28].mxu1 %vm1613_vm11, %v1600_v31  ;;  %v1495_v52 = vpop.permute.xlu1 %1494 }
 0x1ce   : > { %v1368_v59 = vpop.permute.xlu0 %1367 }
 0x1cf   : > { %v1531_v29 = vsel %vm442_vm1, %v4082_v0, %v1368_v59 }
 0x1d0   : > { %v1568_v37 = vsel %vm1566_vm10, %v1531_v29, %v1495_v52 }
 0x1d1   : > { %3296 = vmatprep.mubr.msk.bf16.mxu1 %vm1613_vm11, %v1568_v37 }
 0x1d2   : > { %v1402_v0 = vpop.permute.xlu0 %1401 }
 0x1d5   : > { %3297 = vmatmul.mubr.msk.bf16.vlgmr.msra.gmra.mrb[0].mxu1 %vm1613_vm11, %v4134_v47  ;;  %v1529_v47 = vpop.permute.xlu1 %1528 }
 0x1d6   : > { %3329 = vmatpush3.bf16.msra.mxu1 %v4112_v8  ;;  %3300 = vmatprep.mubr.msk.bf16.mxu1 %vm1613_vm11, %v4143_v25  ;;  %v1565_v8 = vsel %vm442_vm1, %v4115_v23, %v1402_v0  ;;  %v4303_v23 = vld [vmem:[%s4721_s6] ss:$0 sm:$0xff] }
 0x1dd   : > { %3301 = vmatmul.mubr.msk.bf16.gmra.mrb[4].mxu1 %vm1613_vm11, %v4153_v12 }
 0x1de   : > { %3304 = vmatprep.mubr.msk.bf16.mxu1 %vm1613_vm11, %v4156_v18 }
 0x1e5   : > { %3305 = vmatmul.mubr.msk.bf16.gmra.mrb[8].mxu1 %vm1613_vm11, %v4167_v53 }
 0x1e6   : > { %3308 = vmatprep.mubr.msk.bf16.mxu1 %vm1613_vm11, %v4170_v26 }
 0x1ed   : > { %3309 = vmatmul.mubr.msk.bf16.gmra.mrb[12].mxu1 %vm1613_vm11, %v4181_v38 }
 0x1ee   : > { %3312 = vmatprep.mubr.msk.bf16.mxu1 %vm1613_vm11, %v4184_v14 }
 0x1f5   : > { %3313 = vmatmul.mubr.msk.bf16.gmra.mrb[16].mxu1 %vm1613_vm11, %v4195_v44 }
 0x1f6   : > { %3316 = vmatprep.mubr.msk.bf16.mxu1 %vm1613_vm11, %v4198_v36 }
 0x1fd   : > { %3317 = vmatmul.mubr.msk.bf16.gmra.mrb[20].mxu1 %vm1613_vm11, %v1590_v56 }
 0x1fe   : > { %3320 = vmatprep.mubr.msk.bf16.mxu1 %vm1613_vm11, %v1592_v57 }
 0x205   : > { %3321 = vmatmul.mubr.msk.bf16.gmra.mrb[24].mxu1 %vm1613_vm11, %v1594_v19 }
 0x206   : > { %3324 = vmatprep.mubr.msk.bf16.mxu1 %vm1613_vm11, %v1596_v20 }
 0x20d   : > { %3325 = vmatmul.mubr.msk.bf16.gmra.mrb[28].mxu1 %vm1613_vm11, %v1598_v35 }
 0x20e   : > { %3330 = vmatprep.mubr.msk.bf16.mxu1 %vm1613_vm11, %v4143_v25  ;;  %v1602_v25 = vsel %vm1566_vm10, %v1565_v8, %v1529_v47 }
 0x215   : > { %3331 = vmatmul.mubr.msk.bf16.vlgmr.msra.gmra.mrb[0].mxu1 %vm1613_vm11, %v4153_v12  ;;  %v2605_v12 = vld [vmem:[%s4725_s10] sm:$0x3] }
 0x216   : > { %3334 = vmatprep.mubr.msk.bf16.mxu1 %vm1613_vm11, %v4156_v18  ;;  %3499 = vmatprep.subr.msk.bf16.mxu0 %vm576_vm0, %v2605_v12  ;;  %v4298_v18 = vld [vmem:[%s4720_s5] ss:$0 sm:$0xff] }
 0x21d   : > { %3335 = vmatmul.mubr.msk.bf16.gmra.mrb[4].mxu1 %vm1613_vm11, %v4167_v53 }
 0x21e   : > { %3338 = vmatprep.mubr.msk.bf16.mxu1 %vm1613_vm11, %v4170_v26 }
 0x225   : > { %3339 = vmatmul.mubr.msk.bf16.gmra.mrb[8].mxu1 %vm1613_vm11, %v4181_v38 }
 0x226   : > { %3342 = vmatprep.mubr.msk.bf16.mxu1 %vm1613_vm11, %v4184_v14 }
 0x22d   : > { %3343 = vmatmul.mubr.msk.bf16.gmra.mrb[12].mxu1 %vm1613_vm11, %v4195_v44 }
 0x22e   : > { %3346 = vmatprep.mubr.msk.bf16.mxu1 %vm1613_vm11, %v4198_v36 }
 0x235   : > { %3347 = vmatmul.mubr.msk.bf16.gmra.mrb[16].mxu1 %vm1613_vm11, %v1590_v56 }
 0x236   : > { %3350 = vmatprep.mubr.msk.bf16.mxu1 %vm1613_vm11, %v1592_v57 }
 0x23d   : > { %3351 = vmatmul.mubr.msk.bf16.gmra.mrb[20].mxu1 %vm1613_vm11, %v1594_v19 }
 0x23e   : > { %3354 = vmatprep.mubr.msk.bf16.mxu1 %vm1613_vm11, %v1596_v20  ;;  %v2607_v20 = vsel %vm576_vm0, %v2605_v12, 0 }
 0x245   : > { %3355 = vmatmul.mubr.msk.bf16.gmra.mrb[24].mxu1 %vm1613_vm11, %v1598_v35 }
 0x246   : > { %3358 = vmatprep.mubr.msk.bf16.mxu1 %vm1613_vm11, %v1600_v31 }
 0x24d   : > { %3359 = vmatmul.mubr.msk.bf16.gmra.mrb[28].mxu1 %vm1613_vm11, %v1602_v25 }
 0x2e8   : > { %v3332_v53 = vpop.f32.mrb[0].mxu1 }
 0x2e9   : > { %v2197_v26 = vmul.f32 %v3332_v53, %v4298_v18  ;;  %v2029_v38 = vpop.f32.mrb[1].mxu1 }
 0x2ea   : > { %v2195_v14 = vmul.f32 %v4298_v18, %v2029_v38  ;;  %v3333_v6 = vpop.f32.mrb[2].mxu1 }
 0x2eb   : > { %v2236_v11 = vadd.f32 %v4303_v23, %v2197_v26  ;;  %v2198_v32 = vmul.f32 %v3333_v6, %v4298_v18  ;;  %v2032_v41 = vpop.f32.mrb[3].mxu1 }
 0x2ec   : > { %v2234_v42 = vadd.f32 %v4303_v23, %v2195_v14  ;;  %v2196_v44 = vmul.f32 %v4298_v18, %v2032_v41 }
 0x2ed   : > { %v2237_v36 = vadd.f32 %v4303_v23, %v2198_v32  ;;  %v2268_v63 = vmax.f32 %v2236_v11, 0.0 }
 0x2ee   : > { %v2235_v50 = vadd.f32 %v4303_v23, %v2196_v44  ;;  %v2266_v3 = vmax.f32 %v2234_v42, 0.0 }
 0x2ef   : > { %v2269_v24 = vmax.f32 %v2237_v36, 0.0 }
 0x2f0   : > { %v2267_v62 = vmax.f32 %v2235_v50, 0.0  ;;  %v3336_v13 = vpop.f32.mrb[4].mxu1 }
 0x2f1   : > { %v2299_v56 = vpack.c.bf16 %v2269_v24, %v2268_v63  ;;  %v2201_v57 = vmul.f32 %v3336_v13, %v4298_v18  ;;  %v2045_v1 = vpop.f32.mrb[5].mxu1 }
 0x2f2   : > { %v2298_v2 = vpack.c.bf16 %v2267_v62, %v2266_v3  ;;  %v2199_v58 = vmul.f32 %v4298_v18, %v2045_v1  ;;  %v3337_v4 = vpop.f32.mrb[6].mxu1 }
 0x2f3   : > { %v2240_v48 = vadd.f32 %v4303_v23, %v2201_v57  ;;  %v2202_v30 = vmul.f32 %v3337_v4, %v4298_v18  ;;  %v2048_v19 = vpop.f32.mrb[7].mxu1 }
 0x2f4   : > { %v2238_v61 = vadd.f32 %v4303_v23, %v2199_v58  ;;  %v2200_v17 = vmul.f32 %v4298_v18, %v2048_v19  ;;  %3364 = vmatprep.mubr.msk.bf16.mxu0 %vm442_vm1, %v2298_v2 }
 0x2f5   : > { %v2241_v55 = vadd.f32 %v4303_v23, %v2202_v30  ;;  %3365 = vmatmul.mubr.msk.bf16.vlgmr.msra.gmra.mrb[32].mxu0 %vm442_vm1, %v2299_v56  ;;  %v2272_v7 = vmax.f32 %v2240_v48, 0.0 }
 0x2f6   : > { %v2239_v54 = vadd.f32 %v4303_v23, %v2200_v17  ;;  %3397 = vmatpush3.bf16.msra.mxu0 %v2607_v20  ;;  %v2270_v35 = vmax.f32 %v2238_v61, 0.0 }
 0x2f7   : > { %v2273_v60 = vmax.f32 %v2241_v55, 0.0 }
 0x2f8   : > { %v2271_v31 = vmax.f32 %v2239_v54, 0.0  ;;  %v3340_v52 = vpop.f32.mrb[8].mxu1 }
 0x2f9   : > { %v2301_v51 = vpack.c.bf16 %v2273_v60, %v2272_v7  ;;  %v2205_v59 = vmul.f32 %v3340_v52, %v4298_v18  ;;  %v2061_v43 = vpop.f32.mrb[9].mxu1 }
 0x2fa   : > { %v2300_v29 = vpack.c.bf16 %v2271_v31, %v2270_v35  ;;  %v2203_v37 = vmul.f32 %v4298_v18, %v2061_v43  ;;  %v3341_v0 = vpop.f32.mrb[10].mxu1 }
 0x2fb   : > { %v2244_v8 = vadd.f32 %v4303_v23, %v2205_v59  ;;  %v2206_v47 = vmul.f32 %v3341_v0, %v4298_v18  ;;  %v2064_v25 = vpop.f32.mrb[11].mxu1 }
 0x2fc   : > { %v2242_v12 = vadd.f32 %v4303_v23, %v2203_v37  ;;  %v2204_v53 = vmul.f32 %v4298_v18, %v2064_v25  ;;  %3368 = vmatprep.mubr.msk.bf16.mxu0 %vm442_vm1, %v2300_v29 }
 0x2fd   : > { %v2245_v26 = vadd.f32 %v4303_v23, %v2206_v47  ;;  %3369 = vmatmul.mubr.msk.bf16.gmra.mrb[36].mxu0 %vm442_vm1, %v2301_v51  ;;  %v2276_v14 = vmax.f32 %v2244_v8, 0.0 }
 0x2fe   : > { %v2243_v38 = vadd.f32 %v4303_v23, %v2204_v53  ;;  %v2274_v11 = vmax.f32 %v2242_v12, 0.0 }
 0x2ff   : > { %v2277_v6 = vmax.f32 %v2245_v26, 0.0 }
 0x300   : > { %v2275_v32 = vmax.f32 %v2243_v38, 0.0  ;;  %v3344_v41 = vpop.f32.mrb[12].mxu1 }
 0x301   : > { %v2303_v42 = vpack.c.bf16 %v2277_v6, %v2276_v14  ;;  %v2209_v44 = vmul.f32 %v3344_v41, %v4298_v18  ;;  %v2077_v36 = vpop.f32.mrb[13].mxu1 }
 0x302   : > { %v2302_v50 = vpack.c.bf16 %v2275_v32, %v2274_v11  ;;  %v2207_v63 = vmul.f32 %v4298_v18, %v2077_v36  ;;  %v3345_v24 = vpop.f32.mrb[14].mxu1 }
 0x303   : > { %v2248_v3 = vadd.f32 %v4303_v23, %v2209_v44  ;;  %v2210_v62 = vmul.f32 %v3345_v24, %v4298_v18  ;;  %v2080_v13 = vpop.f32.mrb[15].mxu1 }
 0x304   : > { %v2246_v56 = vadd.f32 %v4303_v23, %v2207_v63  ;;  %v2208_v57 = vmul.f32 %v4298_v18, %v2080_v13  ;;  %3372 = vmatprep.mubr.msk.bf16.mxu0 %vm442_vm1, %v2302_v50 }
 0x305   : > { %v2249_v1 = vadd.f32 %v4303_v23, %v2210_v62  ;;  %3373 = vmatmul.mubr.msk.bf16.gmra.mrb[40].mxu0 %vm442_vm1, %v2303_v42  ;;  %v2280_v58 = vmax.f32 %v2248_v3, 0.0 }
 0x306   : > { %v2247_v2 = vadd.f32 %v4303_v23, %v2208_v57  ;;  %v2278_v48 = vmax.f32 %v2246_v56, 0.0 }
 0x307   : > { %v2281_v4 = vmax.f32 %v2249_v1, 0.0 }
 0x308   : > { %v2279_v30 = vmax.f32 %v2247_v2, 0.0  ;;  %v3348_v19 = vpop.f32.mrb[16].mxu1 }
 0x309   : > { %v2305_v20 = vpack.c.bf16 %v2281_v4, %v2280_v58  ;;  %v2213_v61 = vmul.f32 %v3348_v19, %v4298_v18  ;;  %v2093_v17 = vpop.f32.mrb[17].mxu1 }
 0x30a   : > { %v2304_v55 = vpack.c.bf16 %v2279_v30, %v2278_v48  ;;  %v2211_v54 = vmul.f32 %v4298_v18, %v2093_v17  ;;  %v3349_v7 = vpop.f32.mrb[18].mxu1 }
 0x30b   : > { %v2252_v60 = vadd.f32 %v4303_v23, %v2213_v61  ;;  %v2214_v35 = vmul.f32 %v3349_v7, %v4298_v18  ;;  %v2096_v31 = vpop.f32.mrb[19].mxu1 }
 0x30c   : > { %v2250_v52 = vadd.f32 %v4303_v23, %v2211_v54  ;;  %v2212_v51 = vmul.f32 %v4298_v18, %v2096_v31  ;;  %3376 = vmatprep.mubr.msk.bf16.mxu0 %vm442_vm1, %v2304_v55 }
 0x30d   : > { %v2253_v59 = vadd.f32 %v4303_v23, %v2214_v35  ;;  %3377 = vmatmul.mubr.msk.bf16.gmra.mrb[44].mxu0 %vm442_vm1, %v2305_v20  ;;  %v2284_v29 = vmax.f32 %v2252_v60, 0.0 }
 0x30e   : > { %v2251_v43 = vadd.f32 %v4303_v23, %v2212_v51  ;;  %v2282_v0 = vmax.f32 %v2250_v52, 0.0 }
 0x30f   : > { %v2285_v37 = vmax.f32 %v2253_v59, 0.0 }
 0x310   : > { %v2283_v8 = vmax.f32 %v2251_v43, 0.0  ;;  %v3352_v47 = vpop.f32.mrb[20].mxu1 }
 0x311   : > { %v2307_v25 = vpack.c.bf16 %v2285_v37, %v2284_v29  ;;  %v2217_v12 = vmul.f32 %v3352_v47, %v4298_v18  ;;  %v2109_v53 = vpop.f32.mrb[21].mxu1 }
 0x312   : > { %v2306_v26 = vpack.c.bf16 %v2283_v8, %v2282_v0  ;;  %v2215_v38 = vmul.f32 %v4298_v18, %v2109_v53  ;;  %v3353_v14 = vpop.f32.mrb[22].mxu1 }
 0x313   : > { %v2256_v6 = vadd.f32 %v4303_v23, %v2217_v12  ;;  %v2218_v11 = vmul.f32 %v3353_v14, %v4298_v18  ;;  %v2112_v32 = vpop.f32.mrb[23].mxu1 }
 0x314   : > { %v2254_v41 = vadd.f32 %v4303_v23, %v2215_v38  ;;  %v2216_v42 = vmul.f32 %v4298_v18, %v2112_v32  ;;  %3380 = vmatprep.mubr.msk.bf16.mxu0 %vm442_vm1, %v2306_v26 }
 0x315   : > { %v2257_v44 = vadd.f32 %v4303_v23, %v2218_v11  ;;  %3381 = vmatmul.mubr.msk.bf16.gmra.mrb[48].mxu0 %vm442_vm1, %v2307_v25  ;;  %v2288_v50 = vmax.f32 %v2256_v6, 0.0 }
 0x316   : > { %v2255_v36 = vadd.f32 %v4303_v23, %v2216_v42  ;;  %v2286_v24 = vmax.f32 %v2254_v41, 0.0 }
 0x317   : > { %v2289_v63 = vmax.f32 %v2257_v44, 0.0 }
 0x318   : > { %v2287_v3 = vmax.f32 %v2255_v36, 0.0  ;;  %v3356_v62 = vpop.f32.mrb[24].mxu1 }
 0x319   : > { %v2309_v13 = vpack.c.bf16 %v2289_v63, %v2288_v50  ;;  %v2221_v56 = vmul.f32 %v3356_v62, %v4298_v18  ;;  %v2125_v57 = vpop.f32.mrb[25].mxu1 }
 0x31a   : > { %v2308_v1 = vpack.c.bf16 %v2287_v3, %v2286_v24  ;;  %v2219_v2 = vmul.f32 %v4298_v18, %v2125_v57  ;;  %v3357_v58 = vpop.f32.mrb[26].mxu1 }
 0x31b   : > { %v2260_v4 = vadd.f32 %v4303_v23, %v2221_v56  ;;  %v2222_v48 = vmul.f32 %v3357_v58, %v4298_v18  ;;  %v2128_v30 = vpop.f32.mrb[27].mxu1  ;;  %v4471_v58 = vld [vmem:[%s4723_s8] ss:$0 sm:$0xff] }
 0x31c   : > { %v2258_v19 = vadd.f32 %v4303_v23, %v2219_v2  ;;  %v2220_v20 = vmul.f32 %v4298_v18, %v2128_v30  ;;  %3384 = vmatprep.mubr.msk.bf16.mxu0 %vm442_vm1, %v2308_v1  ;;  %v4482_v30 = vld [vmem:[%s4724_s9] ss:$0 sm:$0xff] }
 0x31d   : > { %v2261_v61 = vadd.f32 %v4303_v23, %v2222_v48  ;;  %3385 = vmatmul.mubr.msk.bf16.gmra.mrb[52].mxu0 %vm442_vm1, %v2309_v13  ;;  %v2292_v55 = vmax.f32 %v2260_v4, 0.0  ;;  %v4476_v4 = vld [vmem:[%s4726_s11] ss:$0 sm:$0xff] }
 0x31e   : > { %v2259_v17 = vadd.f32 %v4303_v23, %v2220_v20  ;;  %v2290_v7 = vmax.f32 %v2258_v19, 0.0 }
 0x31f   : > { %v2293_v54 = vmax.f32 %v2261_v61, 0.0  ;;  %v4488_v61 = vld [vmem:[%s4727_s12] ss:$0 sm:$0xff] }
 0x320   : > { %v2291_v60 = vmax.f32 %v2259_v17, 0.0  ;;  %v3360_v35 = vpop.f32.mrb[28].mxu1 }
 0x321   : > { %v2311_v31 = vpack.c.bf16 %v2293_v54, %v2292_v55  ;;  %v2225_v52 = vmul.f32 %v3360_v35, %v4298_v18  ;;  %v2141_v51 = vpop.f32.mrb[29].mxu1 }
 0x322   : > { %v2310_v59 = vpack.c.bf16 %v2291_v60, %v2290_v7  ;;  %v2223_v43 = vmul.f32 %v4298_v18, %v2141_v51  ;;  %v3361_v29 = vpop.f32.mrb[30].mxu1 }
 0x323   : > { %v2264_v37 = vadd.f32 %v4303_v23, %v2225_v52  ;;  %v2226_v0 = vmul.f32 %v3361_v29, %v4298_v18  ;;  %v2144_v8 = vpop.f32.mrb[31].mxu1 }
 0x324   : > { %v2262_v47 = vadd.f32 %v4303_v23, %v2223_v43  ;;  %v2224_v25 = vmul.f32 %v4298_v18, %v2144_v8  ;;  %3388 = vmatprep.mubr.msk.bf16.mxu0 %vm442_vm1, %v2310_v59 }
 0x325   : > { %v2265_v12 = vadd.f32 %v4303_v23, %v2226_v0  ;;  %3389 = vmatmul.mubr.msk.bf16.gmra.mrb[56].mxu0 %vm442_vm1, %v2311_v31  ;;  %v2296_v26 = vmax.f32 %v2264_v37, 0.0 }
 0x326   : > { %v2263_v53 = vadd.f32 %v4303_v23, %v2224_v25  ;;  %v2294_v14 = vmax.f32 %v2262_v47, 0.0 }
 0x327   : > { %v2297_v38 = vmax.f32 %v2265_v12, 0.0 }
 0x328   : > { %v2295_v6 = vmax.f32 %v2263_v53, 0.0 }
 0x329   : > { %v2313_v11 = vpack.c.bf16 %v2297_v38, %v2296_v26 }
 0x32a   : > { %v2312_v32 = vpack.c.bf16 %v2295_v6, %v2294_v14 }
 0x32c   : > { %3392 = vmatprep.mubr.msk.bf16.mxu0 %vm442_vm1, %v2312_v32 }
 0x32d   : > { %3393 = vmatmul.mubr.msk.bf16.gmra.mrb[60].mxu0 %vm442_vm1, %v2313_v11 }
 0x32e   : > { %3398 = vmatprep.mubr.msk.bf16.mxu0 %vm442_vm1, %v3621_v5 }
 0x335   : > { %3399 = vmatmul.mubr.msk.bf16.vlgmr.msra.gmra.mrb[64].mxu0 %vm442_vm1, %v3626_v9 }
 0x336   : > { %3402 = vmatprep.mubr.msk.bf16.mxu0 %vm442_vm1, %v3628_v10 }
 0x33d   : > { %3403 = vmatmul.mubr.msk.bf16.gmra.mrb[68].mxu0 %vm442_vm1, %v3640_v15 }
 0x33e   : > { %3406 = vmatprep.mubr.msk.bf16.mxu0 %vm442_vm1, %v3642_v16 }
 0x345   : > { %3407 = vmatmul.mubr.msk.bf16.gmra.mrb[72].mxu0 %vm442_vm1, %v3652_v21 }
 0x346   : > { %3410 = vmatprep.mubr.msk.bf16.mxu0 %vm442_vm1, %v3654_v22 }
 0x34d   : > { %3411 = vmatmul.mubr.msk.bf16.gmra.mrb[76].mxu0 %vm442_vm1, %v3664_v27 }
 0x34e   : > { %3414 = vmatprep.mubr.msk.bf16.mxu0 %vm442_vm1, %v3666_v28 }
 0x355   : > { %3415 = vmatmul.mubr.msk.bf16.gmra.mrb[80].mxu0 %vm442_vm1, %v3676_v33 }
 0x356   : > { %3418 = vmatprep.mubr.msk.bf16.mxu0 %vm442_vm1, %v3678_v34 }
 0x35d   : > { %3419 = vmatmul.mubr.msk.bf16.gmra.mrb[84].mxu0 %vm442_vm1, %v3688_v39 }
 0x35e   : > { %3422 = vmatprep.mubr.msk.bf16.mxu0 %vm442_vm1, %v3690_v40 }
 0x365   : > { %3423 = vmatmul.mubr.msk.bf16.gmra.mrb[88].mxu0 %vm442_vm1, %v3700_v45 }
 0x366   : > { %3426 = vmatprep.mubr.msk.bf16.mxu0 %vm442_vm1, %v3702_v46 }
 0x36d   : > { %3427 = vmatmul.mubr.msk.bf16.gmra.mrb[92].mxu0 %vm442_vm1, %v3710_v49 }
 0x3c8   : > { %v3366_v5 = vpop.f32.mrb[32].mxu0 }
 0x3c9   : > { %v2400_v9 = vpop.f32.mrb[33].mxu0  ;;  %v2536_v48 = vmul.f32 %v3366_v5, %v4471_v58 }
 0x3ca   : > { %v3367_v10 = vpop.f32.mrb[34].mxu0  ;;  %v2534_v19 = vmul.f32 %v4471_v58, %v2400_v9 }
 0x3cb   : > { %v2403_v15 = vpop.f32.mrb[35].mxu0  ;;  %v2537_v17 = vmul.f32 %v3367_v10, %v4471_v58  ;;  %v2575_v31 = vadd.f32 %v4482_v30, %v2536_v48 }
 0x3cc   : > { %v2535_v7 = vmul.f32 %v4471_v58, %v2403_v15  ;;  %v2573_v43 = vadd.f32 %v4482_v30, %v2534_v19 }
 0x3cd   : > { %v2576_v0 = vadd.f32 %v4482_v30, %v2537_v17 }
 0x3ce   : > { %v2574_v25 = vadd.f32 %v4482_v30, %v2535_v7 }
 0x3d0   : > { %v3370_v16 = vpop.f32.mrb[36].mxu0 }
 0x3d1   : > { %v2416_v21 = vpop.f32.mrb[37].mxu0  ;;  %v2540_v26 = vmul.f32 %v3370_v16, %v4471_v58 }
 0x3d2   : > { %v3371_v22 = vpop.f32.mrb[38].mxu0  ;;  %v2538_v6 = vmul.f32 %v4471_v58, %v2416_v21 }
 0x3d3   : > { %v4418_v27 = vpop.f32.mrb[39].mxu0  ;;  %v2541_v9 = vmul.f32 %v3371_v22, %v4471_v58  ;;  %v2579_v17 = vadd.f32 %v4482_v30, %v2540_v26 }
 0x3d4   : > { %v2539_v16 = vmul.f32 %v4471_v58, %v4418_v27  ;;  %v2577_v7 = vadd.f32 %v4482_v30, %v2538_v6 }
 0x3d8   : > { %v4420_v28 = vpop.f32.mrb[40].mxu0 }
 0x3d9   : > { %v4422_v33 = vpop.f32.mrb[41].mxu0 }
 0x3da   : > { %v4424_v34 = vpop.f32.mrb[42].mxu0 }
 0x3db   : > { %v4426_v39 = vpop.f32.mrb[43].mxu0 }
 0x3e0   : > { %v4428_v40 = vpop.f32.mrb[44].mxu0 }
 0x3e1   : > { %v4430_v45 = vpop.f32.mrb[45].mxu0 }
 0x3e2   : > { %v4432_v46 = vpop.f32.mrb[46].mxu0 }
 0x3e3   : > { %v4434_v49 = vpop.f32.mrb[47].mxu0 }
 0x3e8   : > { %v4436_v18 = vpop.f32.mrb[48].mxu0 }
 0x3e9   : > { %v4438_v23 = vpop.f32.mrb[49].mxu0 }
 0x3ea   : > { %v4440_v41 = vpop.f32.mrb[50].mxu0 }
 0x3eb   : > { %v4442_v42 = vpop.f32.mrb[51].mxu0 }
 0x3f0   : > { %v4444_v44 = vpop.f32.mrb[52].mxu0 }
 0x3f1   : > { %v4446_v36 = vpop.f32.mrb[53].mxu0 }
 0x3f2   : > { %v4448_v50 = vpop.f32.mrb[54].mxu0 }
 0x3f3   : > { %v4450_v63 = vpop.f32.mrb[55].mxu0 }
 0x3f8   : > { %v4452_v24 = vpop.f32.mrb[56].mxu0 }
 0x3f9   : > { %v4454_v3 = vpop.f32.mrb[57].mxu0 }
 0x3fa   : > { %v4456_v62 = vpop.f32.mrb[58].mxu0 }
 0x3fb   : > { %v4458_v13 = vpop.f32.mrb[59].mxu0 }
 0x400   : > { %v4460_v56 = vpop.f32.mrb[60].mxu0 }
 0x401   : > { %v4462_v57 = vpop.f32.mrb[61].mxu0 }
 0x402   : > { %v4464_v1 = vpop.f32.mrb[62].mxu0 }
 0x403   : > { %v4466_v2 = vpop.f32.mrb[63].mxu0 }
 0x408   : > { %v3400_v20 = vpop.f32.mrb[64].mxu0 }
 0x409   : > { %v2779_v55 = vmul.f32 %v3400_v20, %v4476_v4  ;;  %v2643_v54 = vpop.f32.mrb[65].mxu0 }
 0x40a   : > { %v2777_v60 = vmul.f32 %v4476_v4, %v2643_v54  ;;  %v3401_v35 = vpop.f32.mrb[66].mxu0 }
 0x40b   : > { %v2818_v52 = vadd.f32 %v4488_v61, %v2779_v55  ;;  %v2780_v51 = vmul.f32 %v3401_v35, %v4476_v4  ;;  %v2646_v59 = vpop.f32.mrb[67].mxu0  ;;  %v2580_v35 = vadd.f32 %v4482_v30, %v2541_v9 }
 0x40c   : > { %v2816_v29 = vadd.f32 %v4488_v61, %v2777_v60  ;;  %v2778_v37 = vmul.f32 %v4476_v4, %v2646_v59 }
 0x40d   : > { %v2850_v8 = vadd.f32 %v2818_v52, %v2575_v31  ;;  %v2819_v47 = vadd.f32 %v4488_v61, %v2780_v51  ;;  %v2578_v51 = vadd.f32 %v4482_v30, %v2539_v16 }
 0x40e   : > { %v2848_v12 = vadd.f32 %v2816_v29, %v2573_v43  ;;  %v2817_v53 = vadd.f32 %v4488_v61, %v2778_v37  ;;  %v2544_v29 = vmul.f32 %v4420_v28, %v4471_v58  ;;  %v2543_v28 = vmul.f32 %v4471_v58, %v4426_v39 }
 0x40f   : > { %v2882_v38 = vmax.f32 %v2850_v8, 0.0  ;;  %v2851_v14 = vadd.f32 %v2819_v47, %v2576_v0  ;;  %v2542_v8 = vmul.f32 %v4471_v58, %v4422_v33 }
 0x410   : > { %v2880_v11 = vmax.f32 %v2848_v12, 0.0  ;;  %v2849_v32 = vadd.f32 %v2817_v53, %v2574_v25  ;;  %v3404_v5 = vpop.f32.mrb[68].mxu0  ;;  %v2545_v53 = vmul.f32 %v4424_v34, %v4471_v58 }
 0x411   : > { %2915 = vst.msk [vmem:[%s4507_s18 + $0x10] sm:$0xff] %vm2912_vm12, %v2882_v38  ;;  %v2883_v10 = vmax.f32 %v2851_v14, 0.0  ;;  %v2783_v15 = vmul.f32 %v3404_v5, %v4476_v4  ;;  %v2659_v48 = vpop.f32.mrb[69].mxu0 }
 0x412   : > { %2913 = vst.msk [vmem:[%s4507_s18] sm:$0xff] %vm2912_vm12, %v2880_v11  ;;  %v2881_v19 = vmax.f32 %v2849_v32, 0.0  ;;  %v2781_v21 = vmul.f32 %v4476_v4, %v2659_v48  ;;  %v3405_v20 = vpop.f32.mrb[70].mxu0  ;;  %v2583_v32 = vadd.f32 %v4482_v30, %v2544_v29  ;;  %v2584_v48 = vadd.f32 %v4482_v30, %v2545_v53 }
 0x413   : > { %2916 = vst.msk [vmem:[%s4507_s18 + $0x18] sm:$0xff] %vm2912_vm12, %v2883_v10  ;;  %v2822_v22 = vadd.f32 %v4488_v61, %v2783_v15  ;;  %v2784_v55 = vmul.f32 %v3405_v20, %v4476_v4  ;;  %v2662_v54 = vpop.f32.mrb[71].mxu0  ;;  %v2581_v10 = vadd.f32 %v4482_v30, %v2542_v8 }
 0x414   : > { %2914 = vst.msk [vmem:[%s4507_s18 + $0x8] sm:$0xff] %vm2912_vm12, %v2881_v19  ;;  %v2820_v27 = vadd.f32 %v4488_v61, %v2781_v21  ;;  %v2782_v60 = vmul.f32 %v4476_v4, %v2662_v54  ;;  %v2582_v21 = vadd.f32 %v4482_v30, %v2543_v28 }
 0x415   : > { %v2854_v31 = vadd.f32 %v2822_v22, %v2579_v17  ;;  %v2823_v52 = vadd.f32 %v4488_v61, %v2784_v55  ;;  %v2548_v22 = vmul.f32 %v4428_v40, %v4471_v58  ;;  %v2547_v40 = vmul.f32 %v4471_v58, %v4434_v49 }
 0x416   : > { %v2852_v59 = vadd.f32 %v2820_v27, %v2577_v7  ;;  %v2821_v43 = vadd.f32 %v4488_v61, %v2782_v60  ;;  %v2546_v7 = vmul.f32 %v4471_v58, %v4430_v45 }
 0x417   : > { %v2886_v37 = vmax.f32 %v2854_v31, 0.0  ;;  %v2855_v0 = vadd.f32 %v2823_v52, %v2580_v35  ;;  %v2549_v31 = vmul.f32 %v4432_v46, %v4471_v58 }
 0x418   : > { %v2884_v47 = vmax.f32 %v2852_v59, 0.0  ;;  %v2853_v25 = vadd.f32 %v2821_v43, %v2578_v51  ;;  %v3408_v12 = vpop.f32.mrb[72].mxu0 }
 0x419   : > { %2919 = vst.msk [vmem:[%s4507_s18 + $0x30] sm:$0xff] %vm2912_vm12, %v2886_v37  ;;  %v2887_v26 = vmax.f32 %v2855_v0, 0.0  ;;  %v2787_v38 = vmul.f32 %v3408_v12, %v4476_v4  ;;  %v2675_v14 = vpop.f32.mrb[73].mxu0  ;;  %v2587_v37 = vadd.f32 %v4482_v30, %v2548_v22  ;;  %v2588_v12 = vadd.f32 %v4482_v30, %v2549_v31 }
 0x41a   : > { %2917 = vst.msk [vmem:[%s4507_s18 + $0x20] sm:$0xff] %vm2912_vm12, %v2884_v47  ;;  %v2885_v6 = vmax.f32 %v2853_v25, 0.0  ;;  %v2785_v33 = vmul.f32 %v4476_v4, %v2675_v14  ;;  %v3409_v11 = vpop.f32.mrb[74].mxu0  ;;  %v2585_v47 = vadd.f32 %v4482_v30, %v2546_v7 }
 0x41b   : > { %2920 = vst.msk [vmem:[%s4507_s18 + $0x38] sm:$0xff] %vm2912_vm12, %v2887_v26  ;;  %v2826_v34 = vadd.f32 %v4488_v61, %v2787_v38  ;;  %v2788_v5 = vmul.f32 %v3409_v11, %v4476_v4  ;;  %v2678_v9 = vpop.f32.mrb[75].mxu0  ;;  %v2586_v38 = vadd.f32 %v4482_v30, %v2547_v40  ;;  %v2554_v40 = vmul.f32 %v4471_v58, %v4446_v36 }
 0x41c   : > { %2918 = vst.msk [vmem:[%s4507_s18 + $0x28] sm:$0xff] %vm2912_vm12, %v2885_v6  ;;  %v2824_v39 = vadd.f32 %v4488_v61, %v2785_v33  ;;  %v2786_v15 = vmul.f32 %v4476_v4, %v2678_v9  ;;  %v2552_v6 = vmul.f32 %v4436_v18, %v4471_v58  ;;  %v2551_v18 = vmul.f32 %v4471_v58, %v4442_v42 }
 0x41d   : > { %v2858_v16 = vadd.f32 %v2826_v34, %v2583_v32  ;;  %v2827_v19 = vadd.f32 %v4488_v61, %v2788_v5  ;;  %v2550_v32 = vmul.f32 %v4471_v58, %v4438_v23 }
 0x41e   : > { %v2856_v20 = vadd.f32 %v2824_v39, %v2581_v10  ;;  %v2825_v17 = vadd.f32 %v4488_v61, %v2786_v15  ;;  %v2553_v10 = vmul.f32 %v4440_v41, %v4471_v58 }
 0x41f   : > { %v2890_v55 = vmax.f32 %v2858_v16, 0.0  ;;  %v2859_v54 = vadd.f32 %v2827_v19, %v2584_v48  ;;  %v2589_v22 = vadd.f32 %v4482_v30, %v2550_v32 }
 0x420   : > { %v2888_v27 = vmax.f32 %v2856_v20, 0.0  ;;  %v2857_v60 = vadd.f32 %v2825_v17, %v2582_v21  ;;  %v3412_v35 = vpop.f32.mrb[76].mxu0  ;;  %v2591_v21 = vadd.f32 %v4482_v30, %v2552_v6 }
 0x421   : > { %2923 = vst.msk [vmem:[%s4507_s18 + $0x50] sm:$0xff] %vm2912_vm12, %v2890_v55  ;;  %v2891_v52 = vmax.f32 %v2859_v54, 0.0  ;;  %v2791_v51 = vmul.f32 %v3412_v35, %v4476_v4  ;;  %v2691_v59 = vpop.f32.mrb[77].mxu0  ;;  %v2592_v54 = vadd.f32 %v4482_v30, %v2553_v10  ;;  %v2558_v10 = vmul.f32 %v4471_v58, %v4454_v3 }
 0x422   : > { %2921 = vst.msk [vmem:[%s4507_s18 + $0x40] sm:$0xff] %vm2912_vm12, %v2888_v27  ;;  %v2889_v43 = vmax.f32 %v2857_v60, 0.0  ;;  %v2789_v45 = vmul.f32 %v4476_v4, %v2691_v59  ;;  %v3413_v29 = vpop.f32.mrb[78].mxu0  ;;  %v2590_v60 = vadd.f32 %v4482_v30, %v2551_v18  ;;  %v2561_v18 = vmul.f32 %v4456_v62, %v4471_v58 }
 0x423   : > { %2924 = vst.msk [vmem:[%s4507_s18 + $0x58] sm:$0xff] %vm2912_vm12, %v2891_v52  ;;  %v2830_v46 = vadd.f32 %v4488_v61, %v2791_v51  ;;  %v2792_v0 = vmul.f32 %v3413_v29, %v4476_v4  ;;  %v2694_v8 = vpop.f32.mrb[79].mxu0  ;;  %v2556_v52 = vmul.f32 %v4444_v44, %v4471_v58  ;;  %v2555_v44 = vmul.f32 %v4471_v58, %v4450_v63 }
 0x424   : > { %2922 = vst.msk [vmem:[%s4507_s18 + $0x48] sm:$0xff] %vm2912_vm12, %v2889_v43  ;;  %v2828_v49 = vadd.f32 %v4488_v61, %v2789_v45  ;;  %v2790_v25 = vmul.f32 %v4476_v4, %v2694_v8 }
 0x425   : > { %v2862_v53 = vadd.f32 %v2830_v46, %v2587_v37  ;;  %v2831_v26 = vadd.f32 %v4488_v61, %v2792_v0  ;;  %v2557_v37 = vmul.f32 %v4448_v50, %v4471_v58 }
 0x426   : > { %v2860_v14 = vadd.f32 %v2828_v49, %v2585_v47  ;;  %v2829_v28 = vadd.f32 %v4488_v61, %v2790_v25  ;;  %v2595_v25 = vadd.f32 %v4482_v30, %v2556_v52  ;;  %v2564_v52 = vmul.f32 %v4460_v56, %v4471_v58 }
 0x427   : > { %v2894_v33 = vmax.f32 %v2862_v53, 0.0  ;;  %v2863_v11 = vadd.f32 %v2831_v26, %v2588_v12  ;;  %v2593_v26 = vadd.f32 %v4482_v30, %v2554_v40  ;;  %v2562_v40 = vmul.f32 %v4471_v58, %v4462_v57 }
 0x428   : > { %v2892_v34 = vmax.f32 %v2860_v14, 0.0  ;;  %v2861_v5 = vadd.f32 %v2829_v28, %v2586_v38  ;;  %v3416_v9 = vpop.f32.mrb[80].mxu0  ;;  %v2596_v14 = vadd.f32 %v4482_v30, %v2557_v37  ;;  %v2565_v37 = vmul.f32 %v4464_v1, %v4471_v58 }
 0x429   : > { %2927 = vst.msk [vmem:[%s4507_s18 + $0x70] sm:$0xff] %vm2912_vm12, %v2894_v33  ;;  %v2895_v39 = vmax.f32 %v2863_v11, 0.0  ;;  %v2795_v15 = vmul.f32 %v3416_v9, %v4476_v4  ;;  %v2707_v48 = vpop.f32.mrb[81].mxu0  ;;  %v2594_v33 = vadd.f32 %v4482_v30, %v2555_v44  ;;  %v2563_v56 = vmul.f32 %v4471_v58, %v4466_v2 }
 0x42a   : > { %2925 = vst.msk [vmem:[%s4507_s18 + $0x60] sm:$0xff] %vm2912_vm12, %v2892_v34  ;;  %v2893_v16 = vmax.f32 %v2861_v5, 0.0  ;;  %v2793_v23 = vmul.f32 %v4476_v4, %v2707_v48  ;;  %v3417_v19 = vpop.f32.mrb[82].mxu0  ;;  %v2560_v34 = vmul.f32 %v4452_v24, %v4471_v58  ;;  %v2559_v24 = vmul.f32 %v4471_v58, %v4458_v13 }
 0x42b   : > { %2928 = vst.msk [vmem:[%s4507_s18 + $0x78] sm:$0xff] %vm2912_vm12, %v2895_v39  ;;  %v2834_v41 = vadd.f32 %v4488_v61, %v2795_v15  ;;  %v2796_v20 = vmul.f32 %v3417_v19, %v4476_v4  ;;  %v2710_v17 = vpop.f32.mrb[83].mxu0 }
 0x42c   : > { %2926 = vst.msk [vmem:[%s4507_s18 + $0x68] sm:$0xff] %vm2912_vm12, %v2893_v16  ;;  %v2832_v42 = vadd.f32 %v4488_v61, %v2793_v23  ;;  %v2794_v55 = vmul.f32 %v4476_v4, %v2710_v17 }
 0x42d   : > { %v2866_v7 = vadd.f32 %v2834_v41, %v2591_v21  ;;  %v2835_v27 = vadd.f32 %v4488_v61, %v2796_v20  ;;  %v2599_v20 = vadd.f32 %v4482_v30, %v2560_v34 }
 0x42e   : > { %v2864_v35 = vadd.f32 %v2832_v42, %v2589_v22  ;;  %v2833_v31 = vadd.f32 %v4488_v61, %v2794_v55  ;;  %v2597_v42 = vadd.f32 %v4482_v30, %v2558_v10 }
 0x42f   : > { %v2898_v51 = vmax.f32 %v2866_v7, 0.0  ;;  %v2867_v59 = vadd.f32 %v2835_v27, %v2592_v54  ;;  %v2600_v54 = vadd.f32 %v4482_v30, %v2561_v18 }
 0x430   : > { %v2896_v43 = vmax.f32 %v2864_v35, 0.0  ;;  %v2865_v45 = vadd.f32 %v2833_v31, %v2590_v60  ;;  %v3420_v29 = vpop.f32.mrb[84].mxu0  ;;  %v2598_v60 = vadd.f32 %v4482_v30, %v2559_v24 }
 0x431   : > { %2931 = vst.msk [vmem:[%s4507_s18 + $0x90] sm:$0xff] %vm2912_vm12, %v2898_v51  ;;  %v2899_v46 = vmax.f32 %v2867_v59, 0.0  ;;  %v2799_v0 = vmul.f32 %v3420_v29, %v4476_v4  ;;  %v2723_v8 = vpop.f32.mrb[85].mxu0 }
 0x432   : > { %2929 = vst.msk [vmem:[%s4507_s18 + $0x80] sm:$0xff] %vm2912_vm12, %v2896_v43  ;;  %v2897_v47 = vmax.f32 %v2865_v45, 0.0  ;;  %v2797_v36 = vmul.f32 %v4476_v4, %v2723_v8  ;;  %v3421_v49 = vpop.f32.mrb[86].mxu0 }
 0x433   : > { %2932 = vst.msk [vmem:[%s4507_s18 + $0x98] sm:$0xff] %vm2912_vm12, %v2899_v46  ;;  %v2838_v50 = vadd.f32 %v4488_v61, %v2799_v0  ;;  %v2800_v12 = vmul.f32 %v3421_v49, %v4476_v4  ;;  %v2726_v53 = vpop.f32.mrb[87].mxu0 }
 0x434   : > { %2930 = vst.msk [vmem:[%s4507_s18 + $0x88] sm:$0xff] %vm2912_vm12, %v2897_v47  ;;  %v2836_v63 = vadd.f32 %v4488_v61, %v2797_v36  ;;  %v2798_v38 = vmul.f32 %v4476_v4, %v2726_v53  ;;  %v2603_v36 = vadd.f32 %v4482_v30, %v2564_v52 }
 0x435   : > { %v2870_v28 = vadd.f32 %v2838_v50, %v2595_v25  ;;  %v2839_v6 = vadd.f32 %v4488_v61, %v2800_v12  ;;  %v2601_v50 = vadd.f32 %v4482_v30, %v2562_v40  ;;  %v2604_v12 = vadd.f32 %v4482_v30, %v2565_v37 }
 0x436   : > { %v2868_v11 = vadd.f32 %v2836_v63, %v2593_v26  ;;  %v2837_v32 = vadd.f32 %v4488_v61, %v2798_v38  ;;  %v2602_v63 = vadd.f32 %v4482_v30, %v2563_v56 }
 0x437   : > { %v2902_v5 = vmax.f32 %v2870_v28, 0.0  ;;  %v2871_v9 = vadd.f32 %v2839_v6, %v2596_v14 }
 0x438   : > { %v2900_v39 = vmax.f32 %v2868_v11, 0.0  ;;  %v2869_v15 = vadd.f32 %v2837_v32, %v2594_v33  ;;  %v3424_v48 = vpop.f32.mrb[88].mxu0 }
 0x439   : > { %2935 = vst.msk [vmem:[%s4507_s18 + $0xb0] sm:$0xff] %vm2912_vm12, %v2902_v5  ;;  %v2903_v16 = vmax.f32 %v2871_v9, 0.0  ;;  %v2803_v23 = vmul.f32 %v3424_v48, %v4476_v4  ;;  %v2739_v19 = vpop.f32.mrb[89].mxu0 }
 0x43a   : > { %2933 = vst.msk [vmem:[%s4507_s18 + $0xa0] sm:$0xff] %vm2912_vm12, %v2900_v39  ;;  %v2901_v21 = vmax.f32 %v2869_v15, 0.0  ;;  %v2801_v3 = vmul.f32 %v4476_v4, %v2739_v19  ;;  %v3425_v41 = vpop.f32.mrb[90].mxu0 }
 0x43b   : > { %2936 = vst.msk [vmem:[%s4507_s18 + $0xb8] sm:$0xff] %vm2912_vm12, %v2903_v16  ;;  %v2842_v62 = vadd.f32 %v4488_v61, %v2803_v23  ;;  %v2804_v17 = vmul.f32 %v3425_v41, %v4476_v4  ;;  %v2742_v22 = vpop.f32.mrb[91].mxu0 }
 0x43c   : > { %2934 = vst.msk [vmem:[%s4507_s18 + $0xa8] sm:$0xff] %vm2912_vm12, %v2901_v21  ;;  %v2840_v13 = vadd.f32 %v4488_v61, %v2801_v3  ;;  %v2802_v55 = vmul.f32 %v4476_v4, %v2742_v22 }
 0x43d   : > { %v2874_v7 = vadd.f32 %v2842_v62, %v2599_v20  ;;  %v2843_v27 = vadd.f32 %v4488_v61, %v2804_v17 }
 0x43e   : > { %v2872_v35 = vadd.f32 %v2840_v13, %v2597_v42  ;;  %v2841_v31 = vadd.f32 %v4488_v61, %v2802_v55 }
 0x43f   : > { %v2906_v51 = vmax.f32 %v2874_v7, 0.0  ;;  %v2875_v59 = vadd.f32 %v2843_v27, %v2600_v54 }
 0x440   : > { %v2904_v43 = vmax.f32 %v2872_v35, 0.0  ;;  %v2873_v45 = vadd.f32 %v2841_v31, %v2598_v60  ;;  %v3428_v29 = vpop.f32.mrb[92].mxu0 }
 0x441   : > { %2939 = vst.msk [vmem:[%s4507_s18 + $0xd0] sm:$0xff] %vm2912_vm12, %v2906_v51  ;;  %v2907_v46 = vmax.f32 %v2875_v59, 0.0  ;;  %v2807_v0 = vmul.f32 %v3428_v29, %v4476_v4  ;;  %v2755_v8 = vpop.f32.mrb[93].mxu0 }
 0x442   : > { %2937 = vst.msk [vmem:[%s4507_s18 + $0xc0] sm:$0xff] %vm2912_vm12, %v2904_v43  ;;  %v2905_v44 = vmax.f32 %v2873_v45, 0.0  ;;  %v2805_v57 = vmul.f32 %v4476_v4, %v2755_v8  ;;  %v3429_v47 = vpop.f32.mrb[94].mxu0 }
 0x443   : > { %2940 = vst.msk [vmem:[%s4507_s18 + $0xd8] sm:$0xff] %vm2912_vm12, %v2907_v46  ;;  %v2846_v1 = vadd.f32 %v4488_v61, %v2807_v0  ;;  %v2808_v49 = vmul.f32 %v3429_v47, %v4476_v4  ;;  %v2758_v25 = vpop.f32.mrb[95].mxu0 }
 0x444   : > { %2938 = vst.msk [vmem:[%s4507_s18 + $0xc8] sm:$0xff] %vm2912_vm12, %v2905_v44  ;;  %v2844_v2 = vadd.f32 %v4488_v61, %v2805_v57  ;;  %v2806_v58 = vmul.f32 %v4476_v4, %v2758_v25 }
 0x445   : > { %v2878_v53 = vadd.f32 %v2846_v1, %v2603_v36  ;;  %v2847_v26 = vadd.f32 %v4488_v61, %v2808_v49 }
 0x446   : > { %v2876_v38 = vadd.f32 %v2844_v2, %v2601_v50  ;;  %v2845_v14 = vadd.f32 %v4488_v61, %v2806_v58 }
 0x447   : > { %v2910_v28 = vmax.f32 %v2878_v53, 0.0  ;;  %v2879_v6 = vadd.f32 %v2847_v26, %v2604_v12 }
 0x448   : > { %v2908_v33 = vmax.f32 %v2876_v38, 0.0  ;;  %v2877_v11 = vadd.f32 %v2845_v14, %v2602_v63 }
 0x449   : > { %2943 = vst.msk [vmem:[%s4507_s18 + $0xf0] sm:$0xff] %vm2912_vm12, %v2910_v28  ;;  %v2911_v32 = vmax.f32 %v2879_v6, 0.0 }
 0x44a   : > { %2941 = vst.msk [vmem:[%s4507_s18 + $0xe0] sm:$0xff] %vm2912_vm12, %v2908_v33  ;;  %v2909_v4 = vmax.f32 %v2877_v11, 0.0 }
 0x44b   : > { %2944 = vst.msk [vmem:[%s4507_s18 + $0xf8] sm:$0xff] %vm2912_vm12, %v2911_v32 }
 0x44c   : > { %2942 = vst.msk [vmem:[%s4507_s18 + $0xe8] sm:$0xff] %vm2912_vm12, %v2909_v4 }
 0x44d PF: > { %s23_s25 = sadd.s32 1, %s3520_s25  }
 0x44e   : > { %p20_p4 = scmp.ge.s32.totalorder %s23_s25, 4  }
 0x450   :  { %22 = sbr.rel (!%p20_p4) target bundleno = 1 (0x1), region = 105 }

</bundles_post_ra>
